<compile_context>
chip_gen: v5e
topology: v5e:2x2
jax: 0.10.0
libtpu: 0.0.40
codegen_flags: <defaults>
</compile_context>

<pallas_src>
import math

import jax
import jax.numpy as jnp
from jax.experimental import pallas as pl
from jax.experimental.pallas import tpu as pltpu

IN_FEAT = 8
HID = 32
OUT_FEAT = 4
HEADS = 4
DH = HID // HEADS          # per-head feature dim (heads concatenated -> HID)
LAYERS = 3
POOL_RATIO = 0.5
NEG_SLOPE = 0.2            # GATConv LeakyReLU slope
NEG_BIG = -1e9             # softmax edge mask
NEG_HUGE = -1e30           # score / max-readout mask


# ----------------------------- fused Pallas kernel ------------------------- #

def _make_fused_kernel(n_nodes, k_schedule):
    """Build the fused per-graph kernel (one graph per grid step, all in VMEM)."""
    N = n_nodes

    def kernel(x_ref, adj_ref, w_ref, asrc_ref, adst_ref, p_ref, hmask_ref,
               wih_ref, whh_ref, blstm_ref, wl_ref, bl_ref, w3_ref, b3_ref,
               o_ref):
        x = x_ref[0]                       # (N, HID) zero-padded node features
        adj = adj_ref[0]                   # (N, N)
        hmask = hmask_ref[...]             # (HEADS, HID) one-hot head column masks

        ii = jax.lax.broadcasted_iota(jnp.int32, (N, N), 0)
        jj = jax.lax.broadcasted_iota(jnp.int32, (N, N), 1)
        eye = (ii == jj).astype(jnp.float32)
        keep = jnp.ones((N, 1), jnp.float32)          # node-alive mask (no gather)

        readouts = []
        for layer in range(LAYERS):                   # static unroll, LAYERS == 3
            # ---- GAT conv: all heads batched, ReLU epilogue ----
            h = jnp.dot(x, w_ref[layer], preferred_element_type=jnp.float32)          # (N, HID)
            att_s = jnp.dot(h, asrc_ref[layer], preferred_element_type=jnp.float32)   # (N, HEADS)
            att_d = jnp.dot(h, adst_ref[layer], preferred_element_type=jnp.float32)   # (N, HEADS)
            att_s_t = jnp.transpose(att_s)             # (HEADS, N)
            att_d_t = jnp.transpose(att_d)             # (HEADS, N)
            e = att_d_t[:, :, None] + att_s_t[:, None, :]        # (HEADS, N, N); i=dst, j=src
            e = jnp.where(e > 0, e, NEG_SLOPE * e)               # LeakyReLU(0.2)
            e = jnp.where(adj[None, :, :] > 0, e, NEG_BIG)       # mask non-edges
            e = e - jnp.max(e, axis=-1, keepdims=True)
            pe = jnp.exp(e)
            inv = pl.reciprocal(jnp.sum(pe, axis=-1, keepdims=True), approx=True)
            p_att = pe * inv                                     # edge softmax (HEADS, N, N)

            h_heads = h[None, :, :] * hmask[:, None, :]          # (HEADS, N, HID)
            agg = jnp.einsum('hij,hjc->hic', p_att, h_heads,
                             preferred_element_type=jnp.float32)  # (HEADS, N, HID)
            out = agg[0]
            for hd in range(1, HEADS):
                out = out + agg[hd]                              # head concat via masked cols
            out = jnp.maximum(out, 0.0)                          # F.relu after conv (N, HID)

            # ---- top-k pool (rank/mask form, no sort/gather) ----
            k_i = k_schedule[layer]                              # static per layer
            scores = jnp.sum(out * p_ref[layer], axis=1, keepdims=True)   # (N, 1)
            sc = jnp.where(keep > 0, scores, NEG_HUGE)           # exclude dropped nodes
            sc_t = jnp.transpose(sc)                             # (1, N)
            better = jnp.logical_or(sc_t > sc,
                                    jnp.logical_and(sc_t == sc, jj < ii))
            rank = jnp.sum(better.astype(jnp.float32), axis=1, keepdims=True)
            keep = (rank < float(k_i)).astype(jnp.float32)       # new keep mask (N, 1)
            x = out * jnp.tanh(scores) * keep                    # scale kept, zero dropped
            adj = adj * keep * jnp.transpose(keep)               # restrict edges to kept
            adj = jnp.maximum(adj, eye * keep)                   # keep self-loops on kept

            # ---- readout: mean || max over kept nodes ----
            mean = jnp.sum(x, axis=0, keepdims=True) * (1.0 / k_i)               # (1, HID)
            mx = jnp.max(jnp.where(keep > 0, x, NEG_HUGE), axis=0, keepdims=True)  # (1, HID)
            readouts.append(jnp.concatenate([mean, mx], axis=-1))                # (1, 2*HID)

        # ---- LSTM head (input projection hoisted out of the recurrence) ----
        seq = jnp.concatenate(readouts, axis=0)                  # (T, 2*HID), T == LAYERS
        gates_in = (jnp.dot(seq, wih_ref[...], preferred_element_type=jnp.float32)
                    + blstm_ref[...])                            # (T, 4*HID) [i | f | g | o]
        hs = jnp.zeros((1, HID), jnp.float32)
        cs = jnp.zeros((1, HID), jnp.float32)
        for t in range(LAYERS):                                  # static unroll, T == 3
            g = gates_in[t:t + 1, :] + jnp.dot(hs, whh_ref[...],
                                               preferred_element_type=jnp.float32)
            i_g = jax.nn.sigmoid(g[:, 0 * HID:1 * HID])
            f_g = jax.nn.sigmoid(g[:, 1 * HID:2 * HID])
            g_g = jnp.tanh(g[:, 2 * HID:3 * HID])
            o_g = jax.nn.sigmoid(g[:, 3 * HID:4 * HID])
            cs = f_g * cs + i_g * g_g
            hs = o_g * jnp.tanh(cs)

        feat = jnp.maximum(
            jnp.dot(hs, wl_ref[...], preferred_element_type=jnp.float32) + bl_ref[...], 0.0)
        # dropout p=0.0 (eval) -> identity
        o_ref[0] = (jnp.dot(feat, w3_ref[...], preferred_element_type=jnp.float32)
                    + b3_ref[...])                               # (1, OUT_FEAT)

    return kernel


# ------------------------------ wrappers ----------------------------------- #

def _model_forward(params, adj, n_feat):
    B, N, Fin = n_feat.shape
    # pad input features to HID channels so every layer uses the same (HID, HID) weight slot
    x = jnp.pad(n_feat.astype(jnp.float32), ((0, 0), (0, 0), (0, HID - Fin)))

    # static per-layer top-k schedule (same as gather-based top-k with pool_ratio)
    k_sched, n = [], N
    for _ in range(LAYERS):
        k = max(1, int(math.ceil(POOL_RATIO * n)))
        k_sched.append(k)
        n = k

    kernel = _make_fused_kernel(N, tuple(k_sched))

    out3 = pl.pallas_call(
        kernel,
        out_shape=jax.ShapeDtypeStruct((B, 1, OUT_FEAT), jnp.float32),
        grid=(B,),
        in_specs=[
            pl.BlockSpec((1, N, HID), lambda b: (b, 0, 0)),            # node feats (padded)
            pl.BlockSpec((1, N, N), lambda b: (b, 0, 0)),              # adjacency
            pl.BlockSpec((LAYERS, HID, HID), lambda b: (0, 0, 0)),     # GAT weights (stacked)
            pl.BlockSpec((LAYERS, HID, HEADS), lambda b: (0, 0, 0)),   # a_src (block-diag packed)
            pl.BlockSpec((LAYERS, HID, HEADS), lambda b: (0, 0, 0)),   # a_dst (block-diag packed)
            pl.BlockSpec((LAYERS, 1, HID), lambda b: (0, 0, 0)),       # pool projection (normalized)
            pl.BlockSpec((HEADS, HID), lambda b: (0, 0)),              # head column masks
            pl.BlockSpec((2 * HID, 4 * HID), lambda b: (0, 0)),        # LSTM w_ih
            pl.BlockSpec((HID, 4 * HID), lambda b: (0, 0)),            # LSTM w_hh
            pl.BlockSpec((1, 4 * HID), lambda b: (0, 0)),              # LSTM bias (b_ih+b_hh folded)
            pl.BlockSpec((HID, HID), lambda b: (0, 0)),                # lin_lstm W
            pl.BlockSpec((1, HID), lambda b: (0, 0)),                  # lin_lstm b
            pl.BlockSpec((HID, OUT_FEAT), lambda b: (0, 0)),           # lin3 W
            pl.BlockSpec((1, OUT_FEAT), lambda b: (0, 0)),             # lin3 b
        ],
        out_specs=pl.BlockSpec((1, 1, OUT_FEAT), lambda b: (b, 0, 0)),
        compiler_params=pltpu.CompilerParams(dimension_semantics=("parallel",)),
    )(x, adj.astype(jnp.float32),
      params['W_all'], params['Asrc_all'], params['Adst_all'], params['P_all'],
      params['head_mask'],
      params['w_ih'], params['w_hh'], params['b_lstm'],
      params['w_lin_lstm'], params['b_lin_lstm'],
      params['w_lin3'], params['b_lin3'])
    return out3.reshape(B, OUT_FEAT)


model_forward = jax.jit(_model_forward)


def init_params(key):
    keys = jax.random.split(key, 32)
    ki = iter(keys)
    W_list, As_list, Ad_list, P_list = [], [], [], []
    for i in range(LAYERS):
        fin = IN_FEAT if i == 0 else HID
        w = jax.random.normal(next(ki), (fin, HID), jnp.float32) / math.sqrt(fin)
        if fin < HID:
            w = jnp.pad(w, ((0, HID - fin), (0, 0)))   # zero rows match zero-padded features
        a_src = jax.random.normal(next(ki), (HEADS, DH), jnp.float32) * 0.1
        a_dst = jax.random.normal(next(ki), (HEADS, DH), jnp.float32) * 0.1
        # pack per-head attention vectors into (HID, HEADS) block-diagonal matrices
        # so the kernel computes all per-head logits with one matmul.
        asrc_m = jnp.zeros((HID, HEADS), jnp.float32)
        adst_m = jnp.zeros((HID, HEADS), jnp.float32)
        for hd in range(HEADS):
            asrc_m = asrc_m.at[hd * DH:(hd + 1) * DH, hd].set(a_src[hd])
            adst_m = adst_m.at[hd * DH:(hd + 1) * DH, hd].set(a_dst[hd])
        p_vec = jax.random.normal(next(ki), (HID,), jnp.float32) * 0.1
        p_vec = p_vec / (jnp.linalg.norm(p_vec) + 1e-8)   # pre-normalize projection
        W_list.append(w)
        As_list.append(asrc_m)
        Ad_list.append(adst_m)
        P_list.append(p_vec.reshape(1, HID))

    head_ids = jnp.arange(HID, dtype=jnp.int32) // DH
    head_mask = (head_ids[None, :] ==
                 jnp.arange(HEADS, dtype=jnp.int32)[:, None]).astype(jnp.float32)

    s = 1.0 / math.sqrt(HID)
    params = dict(
        W_all=jnp.stack(W_list),          # (LAYERS, HID, HID)
        Asrc_all=jnp.stack(As_list),      # (LAYERS, HID, HEADS)
        Adst_all=jnp.stack(Ad_list),      # (LAYERS, HID, HEADS)
        P_all=jnp.stack(P_list),          # (LAYERS, 1, HID)
        head_mask=head_mask,              # (HEADS, HID)
    )
    params['w_ih'] = jax.random.normal(next(ki), (2 * HID, 4 * HID), jnp.float32) * s
    params['w_hh'] = jax.random.normal(next(ki), (HID, 4 * HID), jnp.float32) * s
    params['b_lstm'] = jax.random.normal(next(ki), (1, 4 * HID), jnp.float32) * s
    params['w_lin_lstm'] = jax.random.normal(next(ki), (HID, HID), jnp.float32) * s
    params['b_lin_lstm'] = jax.random.normal(next(ki), (1, HID), jnp.float32) * s
    params['w_lin3'] = jax.random.normal(next(ki), (HID, OUT_FEAT), jnp.float32) * s
    params['b_lin3'] = jax.random.normal(next(ki), (1, OUT_FEAT), jnp.float32) * s
    return params


if __name__ == "__main__":
    key = jax.random.PRNGKey(0)
    k1, k2, k3 = jax.random.split(key, 3)
    B, N = 2, 16
    n_feat = jax.random.normal(k1, (B, N, IN_FEAT), jnp.float32)
    adj_rand = (jax.random.uniform(k2, (B, N, N)) < 0.3).astype(jnp.float32)
    adj = jnp.maximum(adj_rand, jnp.transpose(adj_rand, (0, 2, 1)))   # symmetrize
    adj = jnp.maximum(adj, jnp.eye(N, dtype=jnp.float32)[None])       # self-loops

    params = init_params(k3)
    out = model_forward(params, adj, n_feat)
    jax.block_until_ready(out)
    assert out.shape == (B, OUT_FEAT)
    assert bool(jnp.all(jnp.isfinite(out)))
    print("KERNEL_OK")
</pallas_src>

<mosaic_0001>
module attributes {stable_mosaic.version = 11 : i64} {
  func.func @kernel(%arg0: i32, %arg1: memref<1x16x32xf32, #tpu.memory_space<vmem>>, %arg2: memref<1x16x16xf32, #tpu.memory_space<vmem>>, %arg3: memref<3x32x32xf32, #tpu.memory_space<vmem>>, %arg4: memref<3x32x4xf32, #tpu.memory_space<vmem>>, %arg5: memref<3x32x4xf32, #tpu.memory_space<vmem>>, %arg6: memref<3x1x32xf32, #tpu.memory_space<vmem>>, %arg7: memref<4x32xf32, #tpu.memory_space<vmem>>, %arg8: memref<64x128xf32, #tpu.memory_space<vmem>>, %arg9: memref<32x128xf32, #tpu.memory_space<vmem>>, %arg10: memref<1x128xf32, #tpu.memory_space<vmem>>, %arg11: memref<32x32xf32, #tpu.memory_space<vmem>>, %arg12: memref<1x32xf32, #tpu.memory_space<vmem>>, %arg13: memref<32x4xf32, #tpu.memory_space<vmem>>, %arg14: memref<1x4xf32, #tpu.memory_space<vmem>>, %arg15: memref<1x1x4xf32, #tpu.memory_space<vmem>>) attributes {dimension_semantics = [#tpu.dimension_semantics<parallel>], iteration_bounds = array<i64: 2>, scalar_prefetch = 0 : i64, scratch_operands = 0 : i64, tpu.core_type = #tpu.core_type<tc>, window_params = [{transform_indices = @transform_0, window_bounds = array<i64: 1, 16, 32>}, {transform_indices = @transform_1, window_bounds = array<i64: 1, 16, 16>}, {pipeline_mode = #tpu.pipeline_mode<synchronous>, transform_indices = @transform_2, window_bounds = array<i64: 3, 32, 32>}, {pipeline_mode = #tpu.pipeline_mode<synchronous>, transform_indices = @transform_3, window_bounds = array<i64: 3, 32, 4>}, {pipeline_mode = #tpu.pipeline_mode<synchronous>, transform_indices = @transform_4, window_bounds = array<i64: 3, 32, 4>}, {pipeline_mode = #tpu.pipeline_mode<synchronous>, transform_indices = @transform_5, window_bounds = array<i64: 3, 1, 32>}, {pipeline_mode = #tpu.pipeline_mode<synchronous>, transform_indices = @transform_6, window_bounds = array<i64: 4, 32>}, {pipeline_mode = #tpu.pipeline_mode<synchronous>, transform_indices = @transform_7, window_bounds = array<i64: 64, 128>}, {pipeline_mode = #tpu.pipeline_mode<synchronous>, transform_indices = @transform_8, window_bounds = array<i64: 32, 128>}, {pipeline_mode = #tpu.pipeline_mode<synchronous>, transform_indices = @transform_9, window_bounds = array<i64: 1, 128>}, {pipeline_mode = #tpu.pipeline_mode<synchronous>, transform_indices = @transform_10, window_bounds = array<i64: 32, 32>}, {pipeline_mode = #tpu.pipeline_mode<synchronous>, transform_indices = @transform_11, window_bounds = array<i64: 1, 32>}, {pipeline_mode = #tpu.pipeline_mode<synchronous>, transform_indices = @transform_12, window_bounds = array<i64: 32, 4>}, {pipeline_mode = #tpu.pipeline_mode<synchronous>, transform_indices = @transform_13, window_bounds = array<i64: 1, 4>}, {transform_indices = @transform_14, window_bounds = array<i64: 1, 1, 4>}]} {
    %c0 = arith.constant 0 : index
    %c0_0 = arith.constant 0 : index
    %c0_1 = arith.constant 0 : index
    %0 = vector.load %arg1[%c0, %c0_0, %c0_1] : memref<1x16x32xf32, #tpu.memory_space<vmem>>, vector<1x16x32xf32>
    %1 = vector.shape_cast %0 : vector<1x16x32xf32> to vector<16x32xf32>
    %c0_2 = arith.constant 0 : index
    %c0_3 = arith.constant 0 : index
    %c0_4 = arith.constant 0 : index
    %2 = vector.load %arg2[%c0_2, %c0_3, %c0_4] : memref<1x16x16xf32, #tpu.memory_space<vmem>>, vector<1x16x16xf32>
    %3 = vector.shape_cast %2 : vector<1x16x16xf32> to vector<16x16xf32>
    %c0_5 = arith.constant 0 : index
    %c0_6 = arith.constant 0 : index
    %4 = vector.load %arg7[%c0_5, %c0_6] : memref<4x32xf32, #tpu.memory_space<vmem>>, vector<4x32xf32>
    %5 = tpu.iota {dimensions = array<i32: 0>} : vector<16x16xi32>
    %6 = tpu.iota {dimensions = array<i32: 1>} : vector<16x16xi32>
    %7 = arith.cmpi eq, %5, %6 : vector<16x16xi32>
    %8 = arith.extui %7 : vector<16x16xi1> to vector<16x16xi32>
    %9 = arith.sitofp %8 : vector<16x16xi32> to vector<16x16xf32>
    %cst = arith.constant 1.000000e+00 : f32
    %10 = vector.broadcast %cst : f32 to vector<16x1xf32>
    %c0_7 = arith.constant 0 : index
    %c0_8 = arith.constant 0 : index
    %c0_9 = arith.constant 0 : index
    %11 = vector.load %arg3[%c0_7, %c0_8, %c0_9] : memref<3x32x32xf32, #tpu.memory_space<vmem>>, vector<1x32x32xf32>
    %12 = vector.shape_cast %11 : vector<1x32x32xf32> to vector<32x32xf32>
    %cst_10 = arith.constant dense<0.000000e+00> : vector<16x32xf32>
    %13 = tpu.matmul %1, %12, %cst_10 {dimension_numbers = #tpu.dot_dimension_numbers<[1], [0], [0], [1], [0, 0, 1, 1], [], []>} : vector<16x32xf32>, vector<32x32xf32>, vector<16x32xf32> -> vector<16x32xf32>
    %c0_11 = arith.constant 0 : index
    %c0_12 = arith.constant 0 : index
    %c0_13 = arith.constant 0 : index
    %14 = vector.load %arg4[%c0_11, %c0_12, %c0_13] : memref<3x32x4xf32, #tpu.memory_space<vmem>>, vector<1x32x4xf32>
    %15 = vector.shape_cast %14 : vector<1x32x4xf32> to vector<32x4xf32>
    %cst_14 = arith.constant dense<0.000000e+00> : vector<16x4xf32>
    %16 = tpu.matmul %13, %15, %cst_14 {dimension_numbers = #tpu.dot_dimension_numbers<[1], [0], [0], [1], [0, 0, 1, 1], [], []>} : vector<16x32xf32>, vector<32x4xf32>, vector<16x4xf32> -> vector<16x4xf32>
    %c0_15 = arith.constant 0 : index
    %c0_16 = arith.constant 0 : index
    %c0_17 = arith.constant 0 : index
    %17 = vector.load %arg5[%c0_15, %c0_16, %c0_17] : memref<3x32x4xf32, #tpu.memory_space<vmem>>, vector<1x32x4xf32>
    %18 = vector.shape_cast %17 : vector<1x32x4xf32> to vector<32x4xf32>
    %cst_18 = arith.constant dense<0.000000e+00> : vector<16x4xf32>
    %19 = tpu.matmul %13, %18, %cst_18 {dimension_numbers = #tpu.dot_dimension_numbers<[1], [0], [0], [1], [0, 0, 1, 1], [], []>} : vector<16x32xf32>, vector<32x4xf32>, vector<16x4xf32> -> vector<16x4xf32>
    %20 = tpu.transpose %16, [1, 0] : vector<16x4xf32> -> vector<4x16xf32>
    %21 = tpu.transpose %19, [1, 0] : vector<16x4xf32> -> vector<4x16xf32>
    %22 = vector.shape_cast %21 : vector<4x16xf32> to vector<4x16x1xf32>
    %23 = vector.shape_cast %20 : vector<4x16xf32> to vector<4x1x16xf32>
    %24 = vector.broadcast %22 : vector<4x16x1xf32> to vector<4x16x16xf32>
    %25 = vector.broadcast %23 : vector<4x1x16xf32> to vector<4x16x16xf32>
    %26 = arith.addf %24, %25 : vector<4x16x16xf32>
    %cst_19 = arith.constant 0.000000e+00 : f32
    %27 = vector.broadcast %cst_19 : f32 to vector<4x16x16xf32>
    %28 = arith.cmpf ogt, %26, %27 : vector<4x16x16xf32>
    %cst_20 = arith.constant 2.000000e-01 : f32
    %29 = vector.broadcast %cst_20 : f32 to vector<4x16x16xf32>
    %30 = arith.mulf %29, %26 : vector<4x16x16xf32>
    %31 = arith.select %28, %26, %30 : vector<4x16x16xi1>, vector<4x16x16xf32>
    %32 = vector.shape_cast %3 : vector<16x16xf32> to vector<1x16x16xf32>
    %cst_21 = arith.constant 0.000000e+00 : f32
    %33 = vector.broadcast %cst_21 : f32 to vector<1x16x16xf32>
    %34 = arith.cmpf ogt, %32, %33 : vector<1x16x16xf32>
    %cst_22 = arith.constant -1.000000e+09 : f32
    %35 = vector.shape_cast %34 : vector<1x16x16xi1> to vector<1x16x16xi1>
    %36 = vector.broadcast %35 : vector<1x16x16xi1> to vector<4x16x16xi1>
    %37 = vector.broadcast %cst_22 : f32 to vector<4x16x16xf32>
    %38 = arith.select %36, %31, %37 : vector<4x16x16xi1>, vector<4x16x16xf32>
    %cst_23 = arith.constant dense<0xFF800000> : vector<4x16xf32>
    %39 = vector.multi_reduction <maximumf>, %38, %cst_23 [2] : vector<4x16x16xf32> to vector<4x16xf32>
    %40 = vector.shape_cast %39 : vector<4x16xf32> to vector<4x16x1xf32>
    %41 = vector.broadcast %40 : vector<4x16x1xf32> to vector<4x16x16xf32>
    %42 = arith.subf %38, %41 : vector<4x16x16xf32>
    %43 = math.exp %42 : vector<4x16x16xf32>
    %cst_24 = arith.constant dense<0.000000e+00> : vector<4x16xf32>
    %44 = vector.multi_reduction <add>, %43, %cst_24 [2] : vector<4x16x16xf32> to vector<4x16xf32>
    %45 = vector.shape_cast %44 : vector<4x16xf32> to vector<4x16x1xf32>
    %46 = tpu.reciprocal %45 {approx = true} : vector<4x16x1xf32> -> vector<4x16x1xf32>
    %47 = vector.broadcast %46 : vector<4x16x1xf32> to vector<4x16x16xf32>
    %48 = arith.mulf %43, %47 : vector<4x16x16xf32>
    %49 = vector.shape_cast %13 : vector<16x32xf32> to vector<1x16x32xf32>
    %50 = vector.shape_cast %4 : vector<4x32xf32> to vector<4x1x32xf32>
    %51 = vector.broadcast %49 : vector<1x16x32xf32> to vector<4x16x32xf32>
    %52 = vector.broadcast %50 : vector<4x1x32xf32> to vector<4x16x32xf32>
    %53 = arith.mulf %51, %52 : vector<4x16x32xf32>
    "tpu.trace_start"() <{level = 10 : i32, message = "hij,hjc->hic"}> : () -> ()
    %cst_25 = arith.constant dense<0.000000e+00> : vector<4x16x32xf32>
    %54 = tpu.matmul %48, %53, %cst_25 {dimension_numbers = #tpu.dot_dimension_numbers<[2], [1], [1], [2], [0, 0, 0, 1, 1, 2], [0], [0]>} : vector<4x16x16xf32>, vector<4x16x32xf32>, vector<4x16x32xf32> -> vector<4x16x32xf32>
    "tpu.trace_stop"() : () -> ()
    %55 = vector.extract_strided_slice %54 {offsets = [0, 0, 0], sizes = [1, 16, 32], strides = [1, 1, 1]} : vector<4x16x32xf32> to vector<1x16x32xf32>
    %56 = vector.shape_cast %55 : vector<1x16x32xf32> to vector<16x32xf32>
    %57 = vector.extract_strided_slice %54 {offsets = [1, 0, 0], sizes = [1, 16, 32], strides = [1, 1, 1]} : vector<4x16x32xf32> to vector<1x16x32xf32>
    %58 = vector.shape_cast %57 : vector<1x16x32xf32> to vector<16x32xf32>
    %59 = arith.addf %56, %58 : vector<16x32xf32>
    %60 = vector.extract_strided_slice %54 {offsets = [2, 0, 0], sizes = [1, 16, 32], strides = [1, 1, 1]} : vector<4x16x32xf32> to vector<1x16x32xf32>
    %61 = vector.shape_cast %60 : vector<1x16x32xf32> to vector<16x32xf32>
    %62 = arith.addf %59, %61 : vector<16x32xf32>
    %63 = vector.extract_strided_slice %54 {offsets = [3, 0, 0], sizes = [1, 16, 32], strides = [1, 1, 1]} : vector<4x16x32xf32> to vector<1x16x32xf32>
    %64 = vector.shape_cast %63 : vector<1x16x32xf32> to vector<16x32xf32>
    %65 = arith.addf %62, %64 : vector<16x32xf32>
    %cst_26 = arith.constant 0.000000e+00 : f32
    %66 = vector.broadcast %cst_26 : f32 to vector<16x32xf32>
    %67 = arith.maximumf %65, %66 : vector<16x32xf32>
    %c0_27 = arith.constant 0 : index
    %c0_28 = arith.constant 0 : index
    %c0_29 = arith.constant 0 : index
    %68 = vector.load %arg6[%c0_27, %c0_28, %c0_29] : memref<3x1x32xf32, #tpu.memory_space<vmem>>, vector<1x1x32xf32>
    %69 = vector.shape_cast %68 : vector<1x1x32xf32> to vector<1x32xf32>
    %70 = vector.broadcast %69 : vector<1x32xf32> to vector<16x32xf32>
    %71 = arith.mulf %67, %70 : vector<16x32xf32>
    %cst_30 = arith.constant dense<0.000000e+00> : vector<16xf32>
    %72 = vector.multi_reduction <add>, %71, %cst_30 [1] : vector<16x32xf32> to vector<16xf32>
    %73 = vector.shape_cast %72 : vector<16xf32> to vector<16x1xf32>
    %cst_31 = arith.constant 0.000000e+00 : f32
    %74 = vector.broadcast %cst_31 : f32 to vector<16x1xf32>
    %75 = arith.cmpf ogt, %10, %74 : vector<16x1xf32>
    %cst_32 = arith.constant -1.000000e+30 : f32
    %76 = vector.broadcast %cst_32 : f32 to vector<16x1xf32>
    %77 = arith.select %75, %73, %76 : vector<16x1xi1>, vector<16x1xf32>
    %78 = tpu.transpose %77, [1, 0] : vector<16x1xf32> -> vector<1x16xf32>
    %79 = vector.broadcast %78 : vector<1x16xf32> to vector<16x16xf32>
    %80 = vector.broadcast %77 : vector<16x1xf32> to vector<16x16xf32>
    %81 = arith.cmpf ogt, %79, %80 : vector<16x16xf32>
    %82 = vector.broadcast %78 : vector<1x16xf32> to vector<16x16xf32>
    %83 = vector.broadcast %77 : vector<16x1xf32> to vector<16x16xf32>
    %84 = arith.cmpf oeq, %82, %83 : vector<16x16xf32>
    %85 = arith.cmpi slt, %6, %5 : vector<16x16xi32>
    %86 = arith.andi %84, %85 : vector<16x16xi1>
    %87 = arith.ori %81, %86 : vector<16x16xi1>
    %88 = arith.extui %87 : vector<16x16xi1> to vector<16x16xi32>
    %89 = arith.sitofp %88 : vector<16x16xi32> to vector<16x16xf32>
    %cst_33 = arith.constant dense<0.000000e+00> : vector<16xf32>
    %90 = vector.multi_reduction <add>, %89, %cst_33 [1] : vector<16x16xf32> to vector<16xf32>
    %91 = vector.shape_cast %90 : vector<16xf32> to vector<16x1xf32>
    %cst_34 = arith.constant 8.000000e+00 : f32
    %92 = vector.broadcast %cst_34 : f32 to vector<16x1xf32>
    %93 = arith.cmpf olt, %91, %92 : vector<16x1xf32>
    %94 = arith.extui %93 : vector<16x1xi1> to vector<16x1xi32>
    %95 = arith.sitofp %94 : vector<16x1xi32> to vector<16x1xf32>
    %96 = math.tanh %73 : vector<16x1xf32>
    %97 = vector.broadcast %96 : vector<16x1xf32> to vector<16x32xf32>
    %98 = arith.mulf %67, %97 : vector<16x32xf32>
    %99 = vector.broadcast %95 : vector<16x1xf32> to vector<16x32xf32>
    %100 = arith.mulf %98, %99 : vector<16x32xf32>
    %101 = vector.broadcast %95 : vector<16x1xf32> to vector<16x16xf32>
    %102 = arith.mulf %3, %101 : vector<16x16xf32>
    %103 = tpu.transpose %95, [1, 0] : vector<16x1xf32> -> vector<1x16xf32>
    %104 = vector.broadcast %103 : vector<1x16xf32> to vector<16x16xf32>
    %105 = arith.mulf %102, %104 : vector<16x16xf32>
    %106 = vector.broadcast %95 : vector<16x1xf32> to vector<16x16xf32>
    %107 = arith.mulf %9, %106 : vector<16x16xf32>
    %108 = arith.maximumf %105, %107 : vector<16x16xf32>
    %cst_35 = arith.constant dense<0.000000e+00> : vector<32xf32>
    %109 = vector.multi_reduction <add>, %100, %cst_35 [0] : vector<16x32xf32> to vector<32xf32>
    %110 = vector.shape_cast %109 : vector<32xf32> to vector<1x32xf32>
    %cst_36 = arith.constant 1.250000e-01 : f32
    %111 = vector.broadcast %cst_36 : f32 to vector<1x32xf32>
    %112 = arith.mulf %110, %111 : vector<1x32xf32>
    %cst_37 = arith.constant 0.000000e+00 : f32
    %113 = vector.broadcast %cst_37 : f32 to vector<16x1xf32>
    %114 = arith.cmpf ogt, %95, %113 : vector<16x1xf32>
    %cst_38 = arith.constant -1.000000e+30 : f32
    %115 = vector.shape_cast %114 : vector<16x1xi1> to vector<16x1xi1>
    %116 = vector.broadcast %115 : vector<16x1xi1> to vector<16x32xi1>
    %117 = vector.broadcast %cst_38 : f32 to vector<16x32xf32>
    %118 = arith.select %116, %100, %117 : vector<16x32xi1>, vector<16x32xf32>
    %cst_39 = arith.constant dense<0xFF800000> : vector<32xf32>
    %119 = vector.multi_reduction <maximumf>, %118, %cst_39 [0] : vector<16x32xf32> to vector<32xf32>
    %120 = vector.shape_cast %119 : vector<32xf32> to vector<1x32xf32>
    %121 = tpu.concatenate %112, %120 in 1 : vector<1x32xf32>, vector<1x32xf32> -> vector<1x64xf32>
    %c1 = arith.constant 1 : index
    %c0_40 = arith.constant 0 : index
    %c0_41 = arith.constant 0 : index
    %122 = vector.load %arg3[%c1, %c0_40, %c0_41] : memref<3x32x32xf32, #tpu.memory_space<vmem>>, vector<1x32x32xf32>
    %123 = vector.shape_cast %122 : vector<1x32x32xf32> to vector<32x32xf32>
    %cst_42 = arith.constant dense<0.000000e+00> : vector<16x32xf32>
    %124 = tpu.matmul %100, %123, %cst_42 {dimension_numbers = #tpu.dot_dimension_numbers<[1], [0], [0], [1], [0, 0, 1, 1], [], []>} : vector<16x32xf32>, vector<32x32xf32>, vector<16x32xf32> -> vector<16x32xf32>
    %c1_43 = arith.constant 1 : index
    %c0_44 = arith.constant 0 : index
    %c0_45 = arith.constant 0 : index
    %125 = vector.load %arg4[%c1_43, %c0_44, %c0_45] : memref<3x32x4xf32, #tpu.memory_space<vmem>>, vector<1x32x4xf32>
    %126 = vector.shape_cast %125 : vector<1x32x4xf32> to vector<32x4xf32>
    %cst_46 = arith.constant dense<0.000000e+00> : vector<16x4xf32>
    %127 = tpu.matmul %124, %126, %cst_46 {dimension_numbers = #tpu.dot_dimension_numbers<[1], [0], [0], [1], [0, 0, 1, 1], [], []>} : vector<16x32xf32>, vector<32x4xf32>, vector<16x4xf32> -> vector<16x4xf32>
    %c1_47 = arith.constant 1 : index
    %c0_48 = arith.constant 0 : index
    %c0_49 = arith.constant 0 : index
    %128 = vector.load %arg5[%c1_47, %c0_48, %c0_49] : memref<3x32x4xf32, #tpu.memory_space<vmem>>, vector<1x32x4xf32>
    %129 = vector.shape_cast %128 : vector<1x32x4xf32> to vector<32x4xf32>
    %cst_50 = arith.constant dense<0.000000e+00> : vector<16x4xf32>
    %130 = tpu.matmul %124, %129, %cst_50 {dimension_numbers = #tpu.dot_dimension_numbers<[1], [0], [0], [1], [0, 0, 1, 1], [], []>} : vector<16x32xf32>, vector<32x4xf32>, vector<16x4xf32> -> vector<16x4xf32>
    %131 = tpu.transpose %127, [1, 0] : vector<16x4xf32> -> vector<4x16xf32>
    %132 = tpu.transpose %130, [1, 0] : vector<16x4xf32> -> vector<4x16xf32>
    %133 = vector.shape_cast %132 : vector<4x16xf32> to vector<4x16x1xf32>
    %134 = vector.shape_cast %131 : vector<4x16xf32> to vector<4x1x16xf32>
    %135 = vector.broadcast %133 : vector<4x16x1xf32> to vector<4x16x16xf32>
    %136 = vector.broadcast %134 : vector<4x1x16xf32> to vector<4x16x16xf32>
    %137 = arith.addf %135, %136 : vector<4x16x16xf32>
    %cst_51 = arith.constant 0.000000e+00 : f32
    %138 = vector.broadcast %cst_51 : f32 to vector<4x16x16xf32>
    %139 = arith.cmpf ogt, %137, %138 : vector<4x16x16xf32>
    %cst_52 = arith.constant 2.000000e-01 : f32
    %140 = vector.broadcast %cst_52 : f32 to vector<4x16x16xf32>
    %141 = arith.mulf %140, %137 : vector<4x16x16xf32>
    %142 = arith.select %139, %137, %141 : vector<4x16x16xi1>, vector<4x16x16xf32>
    %143 = vector.shape_cast %108 : vector<16x16xf32> to vector<1x16x16xf32>
    %cst_53 = arith.constant 0.000000e+00 : f32
    %144 = vector.broadcast %cst_53 : f32 to vector<1x16x16xf32>
    %145 = arith.cmpf ogt, %143, %144 : vector<1x16x16xf32>
    %cst_54 = arith.constant -1.000000e+09 : f32
    %146 = vector.shape_cast %145 : vector<1x16x16xi1> to vector<1x16x16xi1>
    %147 = vector.broadcast %146 : vector<1x16x16xi1> to vector<4x16x16xi1>
    %148 = vector.broadcast %cst_54 : f32 to vector<4x16x16xf32>
    %149 = arith.select %147, %142, %148 : vector<4x16x16xi1>, vector<4x16x16xf32>
    %cst_55 = arith.constant dense<0xFF800000> : vector<4x16xf32>
    %150 = vector.multi_reduction <maximumf>, %149, %cst_55 [2] : vector<4x16x16xf32> to vector<4x16xf32>
    %151 = vector.shape_cast %150 : vector<4x16xf32> to vector<4x16x1xf32>
    %152 = vector.broadcast %151 : vector<4x16x1xf32> to vector<4x16x16xf32>
    %153 = arith.subf %149, %152 : vector<4x16x16xf32>
    %154 = math.exp %153 : vector<4x16x16xf32>
    %cst_56 = arith.constant dense<0.000000e+00> : vector<4x16xf32>
    %155 = vector.multi_reduction <add>, %154, %cst_56 [2] : vector<4x16x16xf32> to vector<4x16xf32>
    %156 = vector.shape_cast %155 : vector<4x16xf32> to vector<4x16x1xf32>
    %157 = tpu.reciprocal %156 {approx = true} : vector<4x16x1xf32> -> vector<4x16x1xf32>
    %158 = vector.broadcast %157 : vector<4x16x1xf32> to vector<4x16x16xf32>
    %159 = arith.mulf %154, %158 : vector<4x16x16xf32>
    %160 = vector.shape_cast %124 : vector<16x32xf32> to vector<1x16x32xf32>
    %161 = vector.shape_cast %4 : vector<4x32xf32> to vector<4x1x32xf32>
    %162 = vector.broadcast %160 : vector<1x16x32xf32> to vector<4x16x32xf32>
    %163 = vector.broadcast %161 : vector<4x1x32xf32> to vector<4x16x32xf32>
    %164 = arith.mulf %162, %163 : vector<4x16x32xf32>
    "tpu.trace_start"() <{level = 10 : i32, message = "hij,hjc->hic"}> : () -> ()
    %cst_57 = arith.constant dense<0.000000e+00> : vector<4x16x32xf32>
    %165 = tpu.matmul %159, %164, %cst_57 {dimension_numbers = #tpu.dot_dimension_numbers<[2], [1], [1], [2], [0, 0, 0, 1, 1, 2], [0], [0]>} : vector<4x16x16xf32>, vector<4x16x32xf32>, vector<4x16x32xf32> -> vector<4x16x32xf32>
    "tpu.trace_stop"() : () -> ()
    %166 = vector.extract_strided_slice %165 {offsets = [0, 0, 0], sizes = [1, 16, 32], strides = [1, 1, 1]} : vector<4x16x32xf32> to vector<1x16x32xf32>
    %167 = vector.shape_cast %166 : vector<1x16x32xf32> to vector<16x32xf32>
    %168 = vector.extract_strided_slice %165 {offsets = [1, 0, 0], sizes = [1, 16, 32], strides = [1, 1, 1]} : vector<4x16x32xf32> to vector<1x16x32xf32>
    %169 = vector.shape_cast %168 : vector<1x16x32xf32> to vector<16x32xf32>
    %170 = arith.addf %167, %169 : vector<16x32xf32>
    %171 = vector.extract_strided_slice %165 {offsets = [2, 0, 0], sizes = [1, 16, 32], strides = [1, 1, 1]} : vector<4x16x32xf32> to vector<1x16x32xf32>
    %172 = vector.shape_cast %171 : vector<1x16x32xf32> to vector<16x32xf32>
    %173 = arith.addf %170, %172 : vector<16x32xf32>
    %174 = vector.extract_strided_slice %165 {offsets = [3, 0, 0], sizes = [1, 16, 32], strides = [1, 1, 1]} : vector<4x16x32xf32> to vector<1x16x32xf32>
    %175 = vector.shape_cast %174 : vector<1x16x32xf32> to vector<16x32xf32>
    %176 = arith.addf %173, %175 : vector<16x32xf32>
    %cst_58 = arith.constant 0.000000e+00 : f32
    %177 = vector.broadcast %cst_58 : f32 to vector<16x32xf32>
    %178 = arith.maximumf %176, %177 : vector<16x32xf32>
    %c1_59 = arith.constant 1 : index
    %c0_60 = arith.constant 0 : index
    %c0_61 = arith.constant 0 : index
    %179 = vector.load %arg6[%c1_59, %c0_60, %c0_61] : memref<3x1x32xf32, #tpu.memory_space<vmem>>, vector<1x1x32xf32>
    %180 = vector.shape_cast %179 : vector<1x1x32xf32> to vector<1x32xf32>
    %181 = vector.broadcast %180 : vector<1x32xf32> to vector<16x32xf32>
    %182 = arith.mulf %178, %181 : vector<16x32xf32>
    %cst_62 = arith.constant dense<0.000000e+00> : vector<16xf32>
    %183 = vector.multi_reduction <add>, %182, %cst_62 [1] : vector<16x32xf32> to vector<16xf32>
    %184 = vector.shape_cast %183 : vector<16xf32> to vector<16x1xf32>
    %cst_63 = arith.constant 0.000000e+00 : f32
    %185 = vector.broadcast %cst_63 : f32 to vector<16x1xf32>
    %186 = arith.cmpf ogt, %95, %185 : vector<16x1xf32>
    %cst_64 = arith.constant -1.000000e+30 : f32
    %187 = vector.broadcast %cst_64 : f32 to vector<16x1xf32>
    %188 = arith.select %186, %184, %187 : vector<16x1xi1>, vector<16x1xf32>
    %189 = tpu.transpose %188, [1, 0] : vector<16x1xf32> -> vector<1x16xf32>
    %190 = vector.broadcast %189 : vector<1x16xf32> to vector<16x16xf32>
    %191 = vector.broadcast %188 : vector<16x1xf32> to vector<16x16xf32>
    %192 = arith.cmpf ogt, %190, %191 : vector<16x16xf32>
    %193 = vector.broadcast %189 : vector<1x16xf32> to vector<16x16xf32>
    %194 = vector.broadcast %188 : vector<16x1xf32> to vector<16x16xf32>
    %195 = arith.cmpf oeq, %193, %194 : vector<16x16xf32>
    %196 = arith.cmpi slt, %6, %5 : vector<16x16xi32>
    %197 = arith.andi %195, %196 : vector<16x16xi1>
    %198 = arith.ori %192, %197 : vector<16x16xi1>
    %199 = arith.extui %198 : vector<16x16xi1> to vector<16x16xi32>
    %200 = arith.sitofp %199 : vector<16x16xi32> to vector<16x16xf32>
    %cst_65 = arith.constant dense<0.000000e+00> : vector<16xf32>
    %201 = vector.multi_reduction <add>, %200, %cst_65 [1] : vector<16x16xf32> to vector<16xf32>
    %202 = vector.shape_cast %201 : vector<16xf32> to vector<16x1xf32>
    %cst_66 = arith.constant 4.000000e+00 : f32
    %203 = vector.broadcast %cst_66 : f32 to vector<16x1xf32>
    %204 = arith.cmpf olt, %202, %203 : vector<16x1xf32>
    %205 = arith.extui %204 : vector<16x1xi1> to vector<16x1xi32>
    %206 = arith.sitofp %205 : vector<16x1xi32> to vector<16x1xf32>
    %207 = math.tanh %184 : vector<16x1xf32>
    %208 = vector.broadcast %207 : vector<16x1xf32> to vector<16x32xf32>
    %209 = arith.mulf %178, %208 : vector<16x32xf32>
    %210 = vector.broadcast %206 : vector<16x1xf32> to vector<16x32xf32>
    %211 = arith.mulf %209, %210 : vector<16x32xf32>
    %212 = vector.broadcast %206 : vector<16x1xf32> to vector<16x16xf32>
    %213 = arith.mulf %108, %212 : vector<16x16xf32>
    %214 = tpu.transpose %206, [1, 0] : vector<16x1xf32> -> vector<1x16xf32>
    %215 = vector.broadcast %214 : vector<1x16xf32> to vector<16x16xf32>
    %216 = arith.mulf %213, %215 : vector<16x16xf32>
    %217 = vector.broadcast %206 : vector<16x1xf32> to vector<16x16xf32>
    %218 = arith.mulf %9, %217 : vector<16x16xf32>
    %219 = arith.maximumf %216, %218 : vector<16x16xf32>
    %cst_67 = arith.constant dense<0.000000e+00> : vector<32xf32>
    %220 = vector.multi_reduction <add>, %211, %cst_67 [0] : vector<16x32xf32> to vector<32xf32>
    %221 = vector.shape_cast %220 : vector<32xf32> to vector<1x32xf32>
    %cst_68 = arith.constant 2.500000e-01 : f32
    %222 = vector.broadcast %cst_68 : f32 to vector<1x32xf32>
    %223 = arith.mulf %221, %222 : vector<1x32xf32>
    %cst_69 = arith.constant 0.000000e+00 : f32
    %224 = vector.broadcast %cst_69 : f32 to vector<16x1xf32>
    %225 = arith.cmpf ogt, %206, %224 : vector<16x1xf32>
    %cst_70 = arith.constant -1.000000e+30 : f32
    %226 = vector.shape_cast %225 : vector<16x1xi1> to vector<16x1xi1>
    %227 = vector.broadcast %226 : vector<16x1xi1> to vector<16x32xi1>
    %228 = vector.broadcast %cst_70 : f32 to vector<16x32xf32>
    %229 = arith.select %227, %211, %228 : vector<16x32xi1>, vector<16x32xf32>
    %cst_71 = arith.constant dense<0xFF800000> : vector<32xf32>
    %230 = vector.multi_reduction <maximumf>, %229, %cst_71 [0] : vector<16x32xf32> to vector<32xf32>
    %231 = vector.shape_cast %230 : vector<32xf32> to vector<1x32xf32>
    %232 = tpu.concatenate %223, %231 in 1 : vector<1x32xf32>, vector<1x32xf32> -> vector<1x64xf32>
    %c2 = arith.constant 2 : index
    %c0_72 = arith.constant 0 : index
    %c0_73 = arith.constant 0 : index
    %233 = vector.load %arg3[%c2, %c0_72, %c0_73] : memref<3x32x32xf32, #tpu.memory_space<vmem>>, vector<1x32x32xf32>
    %234 = vector.shape_cast %233 : vector<1x32x32xf32> to vector<32x32xf32>
    %cst_74 = arith.constant dense<0.000000e+00> : vector<16x32xf32>
    %235 = tpu.matmul %211, %234, %cst_74 {dimension_numbers = #tpu.dot_dimension_numbers<[1], [0], [0], [1], [0, 0, 1, 1], [], []>} : vector<16x32xf32>, vector<32x32xf32>, vector<16x32xf32> -> vector<16x32xf32>
    %c2_75 = arith.constant 2 : index
    %c0_76 = arith.constant 0 : index
    %c0_77 = arith.constant 0 : index
    %236 = vector.load %arg4[%c2_75, %c0_76, %c0_77] : memref<3x32x4xf32, #tpu.memory_space<vmem>>, vector<1x32x4xf32>
    %237 = vector.shape_cast %236 : vector<1x32x4xf32> to vector<32x4xf32>
    %cst_78 = arith.constant dense<0.000000e+00> : vector<16x4xf32>
    %238 = tpu.matmul %235, %237, %cst_78 {dimension_numbers = #tpu.dot_dimension_numbers<[1], [0], [0], [1], [0, 0, 1, 1], [], []>} : vector<16x32xf32>, vector<32x4xf32>, vector<16x4xf32> -> vector<16x4xf32>
    %c2_79 = arith.constant 2 : index
    %c0_80 = arith.constant 0 : index
    %c0_81 = arith.constant 0 : index
    %239 = vector.load %arg5[%c2_79, %c0_80, %c0_81] : memref<3x32x4xf32, #tpu.memory_space<vmem>>, vector<1x32x4xf32>
    %240 = vector.shape_cast %239 : vector<1x32x4xf32> to vector<32x4xf32>
    %cst_82 = arith.constant dense<0.000000e+00> : vector<16x4xf32>
    %241 = tpu.matmul %235, %240, %cst_82 {dimension_numbers = #tpu.dot_dimension_numbers<[1], [0], [0], [1], [0, 0, 1, 1], [], []>} : vector<16x32xf32>, vector<32x4xf32>, vector<16x4xf32> -> vector<16x4xf32>
    %242 = tpu.transpose %238, [1, 0] : vector<16x4xf32> -> vector<4x16xf32>
    %243 = tpu.transpose %241, [1, 0] : vector<16x4xf32> -> vector<4x16xf32>
    %244 = vector.shape_cast %243 : vector<4x16xf32> to vector<4x16x1xf32>
    %245 = vector.shape_cast %242 : vector<4x16xf32> to vector<4x1x16xf32>
    %246 = vector.broadcast %244 : vector<4x16x1xf32> to vector<4x16x16xf32>
    %247 = vector.broadcast %245 : vector<4x1x16xf32> to vector<4x16x16xf32>
    %248 = arith.addf %246, %247 : vector<4x16x16xf32>
    %cst_83 = arith.constant 0.000000e+00 : f32
    %249 = vector.broadcast %cst_83 : f32 to vector<4x16x16xf32>
    %250 = arith.cmpf ogt, %248, %249 : vector<4x16x16xf32>
    %cst_84 = arith.constant 2.000000e-01 : f32
    %251 = vector.broadcast %cst_84 : f32 to vector<4x16x16xf32>
    %252 = arith.mulf %251, %248 : vector<4x16x16xf32>
    %253 = arith.select %250, %248, %252 : vector<4x16x16xi1>, vector<4x16x16xf32>
    %254 = vector.shape_cast %219 : vector<16x16xf32> to vector<1x16x16xf32>
    %cst_85 = arith.constant 0.000000e+00 : f32
    %255 = vector.broadcast %cst_85 : f32 to vector<1x16x16xf32>
    %256 = arith.cmpf ogt, %254, %255 : vector<1x16x16xf32>
    %cst_86 = arith.constant -1.000000e+09 : f32
    %257 = vector.shape_cast %256 : vector<1x16x16xi1> to vector<1x16x16xi1>
    %258 = vector.broadcast %257 : vector<1x16x16xi1> to vector<4x16x16xi1>
    %259 = vector.broadcast %cst_86 : f32 to vector<4x16x16xf32>
    %260 = arith.select %258, %253, %259 : vector<4x16x16xi1>, vector<4x16x16xf32>
    %cst_87 = arith.constant dense<0xFF800000> : vector<4x16xf32>
    %261 = vector.multi_reduction <maximumf>, %260, %cst_87 [2] : vector<4x16x16xf32> to vector<4x16xf32>
    %262 = vector.shape_cast %261 : vector<4x16xf32> to vector<4x16x1xf32>
    %263 = vector.broadcast %262 : vector<4x16x1xf32> to vector<4x16x16xf32>
    %264 = arith.subf %260, %263 : vector<4x16x16xf32>
    %265 = math.exp %264 : vector<4x16x16xf32>
    %cst_88 = arith.constant dense<0.000000e+00> : vector<4x16xf32>
    %266 = vector.multi_reduction <add>, %265, %cst_88 [2] : vector<4x16x16xf32> to vector<4x16xf32>
    %267 = vector.shape_cast %266 : vector<4x16xf32> to vector<4x16x1xf32>
    %268 = tpu.reciprocal %267 {approx = true} : vector<4x16x1xf32> -> vector<4x16x1xf32>
    %269 = vector.broadcast %268 : vector<4x16x1xf32> to vector<4x16x16xf32>
    %270 = arith.mulf %265, %269 : vector<4x16x16xf32>
    %271 = vector.shape_cast %235 : vector<16x32xf32> to vector<1x16x32xf32>
    %272 = vector.shape_cast %4 : vector<4x32xf32> to vector<4x1x32xf32>
    %273 = vector.broadcast %271 : vector<1x16x32xf32> to vector<4x16x32xf32>
    %274 = vector.broadcast %272 : vector<4x1x32xf32> to vector<4x16x32xf32>
    %275 = arith.mulf %273, %274 : vector<4x16x32xf32>
    "tpu.trace_start"() <{level = 10 : i32, message = "hij,hjc->hic"}> : () -> ()
    %cst_89 = arith.constant dense<0.000000e+00> : vector<4x16x32xf32>
    %276 = tpu.matmul %270, %275, %cst_89 {dimension_numbers = #tpu.dot_dimension_numbers<[2], [1], [1], [2], [0, 0, 0, 1, 1, 2], [0], [0]>} : vector<4x16x16xf32>, vector<4x16x32xf32>, vector<4x16x32xf32> -> vector<4x16x32xf32>
    "tpu.trace_stop"() : () -> ()
    %277 = vector.extract_strided_slice %276 {offsets = [0, 0, 0], sizes = [1, 16, 32], strides = [1, 1, 1]} : vector<4x16x32xf32> to vector<1x16x32xf32>
    %278 = vector.shape_cast %277 : vector<1x16x32xf32> to vector<16x32xf32>
    %279 = vector.extract_strided_slice %276 {offsets = [1, 0, 0], sizes = [1, 16, 32], strides = [1, 1, 1]} : vector<4x16x32xf32> to vector<1x16x32xf32>
    %280 = vector.shape_cast %279 : vector<1x16x32xf32> to vector<16x32xf32>
    %281 = arith.addf %278, %280 : vector<16x32xf32>
    %282 = vector.extract_strided_slice %276 {offsets = [2, 0, 0], sizes = [1, 16, 32], strides = [1, 1, 1]} : vector<4x16x32xf32> to vector<1x16x32xf32>
    %283 = vector.shape_cast %282 : vector<1x16x32xf32> to vector<16x32xf32>
    %284 = arith.addf %281, %283 : vector<16x32xf32>
    %285 = vector.extract_strided_slice %276 {offsets = [3, 0, 0], sizes = [1, 16, 32], strides = [1, 1, 1]} : vector<4x16x32xf32> to vector<1x16x32xf32>
    %286 = vector.shape_cast %285 : vector<1x16x32xf32> to vector<16x32xf32>
    %287 = arith.addf %284, %286 : vector<16x32xf32>
    %cst_90 = arith.constant 0.000000e+00 : f32
    %288 = vector.broadcast %cst_90 : f32 to vector<16x32xf32>
    %289 = arith.maximumf %287, %288 : vector<16x32xf32>
    %c2_91 = arith.constant 2 : index
    %c0_92 = arith.constant 0 : index
    %c0_93 = arith.constant 0 : index
    %290 = vector.load %arg6[%c2_91, %c0_92, %c0_93] : memref<3x1x32xf32, #tpu.memory_space<vmem>>, vector<1x1x32xf32>
    %291 = vector.shape_cast %290 : vector<1x1x32xf32> to vector<1x32xf32>
    %292 = vector.broadcast %291 : vector<1x32xf32> to vector<16x32xf32>
    %293 = arith.mulf %289, %292 : vector<16x32xf32>
    %cst_94 = arith.constant dense<0.000000e+00> : vector<16xf32>
    %294 = vector.multi_reduction <add>, %293, %cst_94 [1] : vector<16x32xf32> to vector<16xf32>
    %295 = vector.shape_cast %294 : vector<16xf32> to vector<16x1xf32>
    %cst_95 = arith.constant 0.000000e+00 : f32
    %296 = vector.broadcast %cst_95 : f32 to vector<16x1xf32>
    %297 = arith.cmpf ogt, %206, %296 : vector<16x1xf32>
    %cst_96 = arith.constant -1.000000e+30 : f32
    %298 = vector.broadcast %cst_96 : f32 to vector<16x1xf32>
    %299 = arith.select %297, %295, %298 : vector<16x1xi1>, vector<16x1xf32>
    %300 = tpu.transpose %299, [1, 0] : vector<16x1xf32> -> vector<1x16xf32>
    %301 = vector.broadcast %300 : vector<1x16xf32> to vector<16x16xf32>
    %302 = vector.broadcast %299 : vector<16x1xf32> to vector<16x16xf32>
    %303 = arith.cmpf ogt, %301, %302 : vector<16x16xf32>
    %304 = vector.broadcast %300 : vector<1x16xf32> to vector<16x16xf32>
    %305 = vector.broadcast %299 : vector<16x1xf32> to vector<16x16xf32>
    %306 = arith.cmpf oeq, %304, %305 : vector<16x16xf32>
    %307 = arith.cmpi slt, %6, %5 : vector<16x16xi32>
    %308 = arith.andi %306, %307 : vector<16x16xi1>
    %309 = arith.ori %303, %308 : vector<16x16xi1>
    %310 = arith.extui %309 : vector<16x16xi1> to vector<16x16xi32>
    %311 = arith.sitofp %310 : vector<16x16xi32> to vector<16x16xf32>
    %cst_97 = arith.constant dense<0.000000e+00> : vector<16xf32>
    %312 = vector.multi_reduction <add>, %311, %cst_97 [1] : vector<16x16xf32> to vector<16xf32>
    %313 = vector.shape_cast %312 : vector<16xf32> to vector<16x1xf32>
    %cst_98 = arith.constant 2.000000e+00 : f32
    %314 = vector.broadcast %cst_98 : f32 to vector<16x1xf32>
    %315 = arith.cmpf olt, %313, %314 : vector<16x1xf32>
    %316 = arith.extui %315 : vector<16x1xi1> to vector<16x1xi32>
    %317 = arith.sitofp %316 : vector<16x1xi32> to vector<16x1xf32>
    %318 = math.tanh %295 : vector<16x1xf32>
    %319 = vector.broadcast %318 : vector<16x1xf32> to vector<16x32xf32>
    %320 = arith.mulf %289, %319 : vector<16x32xf32>
    %321 = vector.broadcast %317 : vector<16x1xf32> to vector<16x32xf32>
    %322 = arith.mulf %320, %321 : vector<16x32xf32>
    %cst_99 = arith.constant dense<0.000000e+00> : vector<32xf32>
    %323 = vector.multi_reduction <add>, %322, %cst_99 [0] : vector<16x32xf32> to vector<32xf32>
    %324 = vector.shape_cast %323 : vector<32xf32> to vector<1x32xf32>
    %cst_100 = arith.constant 5.000000e-01 : f32
    %325 = vector.broadcast %cst_100 : f32 to vector<1x32xf32>
    %326 = arith.mulf %324, %325 : vector<1x32xf32>
    %cst_101 = arith.constant 0.000000e+00 : f32
    %327 = vector.broadcast %cst_101 : f32 to vector<16x1xf32>
    %328 = arith.cmpf ogt, %317, %327 : vector<16x1xf32>
    %cst_102 = arith.constant -1.000000e+30 : f32
    %329 = vector.shape_cast %328 : vector<16x1xi1> to vector<16x1xi1>
    %330 = vector.broadcast %329 : vector<16x1xi1> to vector<16x32xi1>
    %331 = vector.broadcast %cst_102 : f32 to vector<16x32xf32>
    %332 = arith.select %330, %322, %331 : vector<16x32xi1>, vector<16x32xf32>
    %cst_103 = arith.constant dense<0xFF800000> : vector<32xf32>
    %333 = vector.multi_reduction <maximumf>, %332, %cst_103 [0] : vector<16x32xf32> to vector<32xf32>
    %334 = vector.shape_cast %333 : vector<32xf32> to vector<1x32xf32>
    %335 = tpu.concatenate %326, %334 in 1 : vector<1x32xf32>, vector<1x32xf32> -> vector<1x64xf32>
    %336 = tpu.concatenate %121, %232, %335 in 0 : vector<1x64xf32>, vector<1x64xf32>, vector<1x64xf32> -> vector<3x64xf32>
    %c0_104 = arith.constant 0 : index
    %c0_105 = arith.constant 0 : index
    %337 = vector.load %arg8[%c0_104, %c0_105] : memref<64x128xf32, #tpu.memory_space<vmem>>, vector<64x128xf32>
    %cst_106 = arith.constant dense<0.000000e+00> : vector<3x128xf32>
    %338 = tpu.matmul %336, %337, %cst_106 {dimension_numbers = #tpu.dot_dimension_numbers<[1], [0], [0], [1], [0, 0, 1, 1], [], []>} : vector<3x64xf32>, vector<64x128xf32>, vector<3x128xf32> -> vector<3x128xf32>
    %c0_107 = arith.constant 0 : index
    %c0_108 = arith.constant 0 : index
    %339 = vector.load %arg10[%c0_107, %c0_108] : memref<1x128xf32, #tpu.memory_space<vmem>>, vector<1x128xf32>
    %340 = vector.broadcast %339 : vector<1x128xf32> to vector<3x128xf32>
    %341 = arith.addf %338, %340 : vector<3x128xf32>
    %cst_109 = arith.constant 0.000000e+00 : f32
    %342 = vector.broadcast %cst_109 : f32 to vector<1x32xf32>
    %cst_110 = arith.constant 0.000000e+00 : f32
    %343 = vector.broadcast %cst_110 : f32 to vector<1x32xf32>
    %344 = vector.extract_strided_slice %341 {offsets = [0, 0], sizes = [1, 128], strides = [1, 1]} : vector<3x128xf32> to vector<1x128xf32>
    %c0_111 = arith.constant 0 : index
    %c0_112 = arith.constant 0 : index
    %345 = vector.load %arg9[%c0_111, %c0_112] : memref<32x128xf32, #tpu.memory_space<vmem>>, vector<32x128xf32>
    %cst_113 = arith.constant dense<0.000000e+00> : vector<1x128xf32>
    %346 = tpu.matmul %342, %345, %cst_113 {dimension_numbers = #tpu.dot_dimension_numbers<[1], [0], [0], [1], [0, 0, 1, 1], [], []>} : vector<1x32xf32>, vector<32x128xf32>, vector<1x128xf32> -> vector<1x128xf32>
    %347 = arith.addf %344, %346 : vector<1x128xf32>
    %348 = vector.extract_strided_slice %347 {offsets = [0, 0], sizes = [1, 32], strides = [1, 1]} : vector<1x128xf32> to vector<1x32xf32>
    %349 = arith.negf %348 : vector<1x32xf32>
    %350 = math.exp %349 : vector<1x32xf32>
    %cst_114 = arith.constant 1.000000e+00 : f32
    %351 = vector.broadcast %cst_114 : f32 to vector<1x32xf32>
    %352 = arith.addf %351, %350 : vector<1x32xf32>
    %353 = arith.divf %351, %352 : vector<1x32xf32>
    %354 = vector.extract_strided_slice %347 {offsets = [0, 32], sizes = [1, 32], strides = [1, 1]} : vector<1x128xf32> to vector<1x32xf32>
    %355 = arith.negf %354 : vector<1x32xf32>
    %356 = math.exp %355 : vector<1x32xf32>
    %cst_115 = arith.constant 1.000000e+00 : f32
    %357 = vector.broadcast %cst_115 : f32 to vector<1x32xf32>
    %358 = arith.addf %357, %356 : vector<1x32xf32>
    %359 = arith.divf %357, %358 : vector<1x32xf32>
    %360 = vector.extract_strided_slice %347 {offsets = [0, 64], sizes = [1, 32], strides = [1, 1]} : vector<1x128xf32> to vector<1x32xf32>
    %361 = math.tanh %360 : vector<1x32xf32>
    %362 = vector.extract_strided_slice %347 {offsets = [0, 96], sizes = [1, 32], strides = [1, 1]} : vector<1x128xf32> to vector<1x32xf32>
    %363 = arith.negf %362 : vector<1x32xf32>
    %364 = math.exp %363 : vector<1x32xf32>
    %cst_116 = arith.constant 1.000000e+00 : f32
    %365 = vector.broadcast %cst_116 : f32 to vector<1x32xf32>
    %366 = arith.addf %365, %364 : vector<1x32xf32>
    %367 = arith.divf %365, %366 : vector<1x32xf32>
    %368 = arith.mulf %359, %343 : vector<1x32xf32>
    %369 = arith.mulf %353, %361 : vector<1x32xf32>
    %370 = arith.addf %368, %369 : vector<1x32xf32>
    %371 = math.tanh %370 : vector<1x32xf32>
    %372 = arith.mulf %367, %371 : vector<1x32xf32>
    %373 = vector.extract_strided_slice %341 {offsets = [1, 0], sizes = [1, 128], strides = [1, 1]} : vector<3x128xf32> to vector<1x128xf32>
    %c0_117 = arith.constant 0 : index
    %c0_118 = arith.constant 0 : index
    %374 = vector.load %arg9[%c0_117, %c0_118] : memref<32x128xf32, #tpu.memory_space<vmem>>, vector<32x128xf32>
    %cst_119 = arith.constant dense<0.000000e+00> : vector<1x128xf32>
    %375 = tpu.matmul %372, %374, %cst_119 {dimension_numbers = #tpu.dot_dimension_numbers<[1], [0], [0], [1], [0, 0, 1, 1], [], []>} : vector<1x32xf32>, vector<32x128xf32>, vector<1x128xf32> -> vector<1x128xf32>
    %376 = arith.addf %373, %375 : vector<1x128xf32>
    %377 = vector.extract_strided_slice %376 {offsets = [0, 0], sizes = [1, 32], strides = [1, 1]} : vector<1x128xf32> to vector<1x32xf32>
    %378 = arith.negf %377 : vector<1x32xf32>
    %379 = math.exp %378 : vector<1x32xf32>
    %cst_120 = arith.constant 1.000000e+00 : f32
    %380 = vector.broadcast %cst_120 : f32 to vector<1x32xf32>
    %381 = arith.addf %380, %379 : vector<1x32xf32>
    %382 = arith.divf %380, %381 : vector<1x32xf32>
    %383 = vector.extract_strided_slice %376 {offsets = [0, 32], sizes = [1, 32], strides = [1, 1]} : vector<1x128xf32> to vector<1x32xf32>
    %384 = arith.negf %383 : vector<1x32xf32>
    %385 = math.exp %384 : vector<1x32xf32>
    %cst_121 = arith.constant 1.000000e+00 : f32
    %386 = vector.broadcast %cst_121 : f32 to vector<1x32xf32>
    %387 = arith.addf %386, %385 : vector<1x32xf32>
    %388 = arith.divf %386, %387 : vector<1x32xf32>
    %389 = vector.extract_strided_slice %376 {offsets = [0, 64], sizes = [1, 32], strides = [1, 1]} : vector<1x128xf32> to vector<1x32xf32>
    %390 = math.tanh %389 : vector<1x32xf32>
    %391 = vector.extract_strided_slice %376 {offsets = [0, 96], sizes = [1, 32], strides = [1, 1]} : vector<1x128xf32> to vector<1x32xf32>
    %392 = arith.negf %391 : vector<1x32xf32>
    %393 = math.exp %392 : vector<1x32xf32>
    %cst_122 = arith.constant 1.000000e+00 : f32
    %394 = vector.broadcast %cst_122 : f32 to vector<1x32xf32>
    %395 = arith.addf %394, %393 : vector<1x32xf32>
    %396 = arith.divf %394, %395 : vector<1x32xf32>
    %397 = arith.mulf %388, %370 : vector<1x32xf32>
    %398 = arith.mulf %382, %390 : vector<1x32xf32>
    %399 = arith.addf %397, %398 : vector<1x32xf32>
    %400 = math.tanh %399 : vector<1x32xf32>
    %401 = arith.mulf %396, %400 : vector<1x32xf32>
    %402 = vector.extract_strided_slice %341 {offsets = [2, 0], sizes = [1, 128], strides = [1, 1]} : vector<3x128xf32> to vector<1x128xf32>
    %c0_123 = arith.constant 0 : index
    %c0_124 = arith.constant 0 : index
    %403 = vector.load %arg9[%c0_123, %c0_124] : memref<32x128xf32, #tpu.memory_space<vmem>>, vector<32x128xf32>
    %cst_125 = arith.constant dense<0.000000e+00> : vector<1x128xf32>
    %404 = tpu.matmul %401, %403, %cst_125 {dimension_numbers = #tpu.dot_dimension_numbers<[1], [0], [0], [1], [0, 0, 1, 1], [], []>} : vector<1x32xf32>, vector<32x128xf32>, vector<1x128xf32> -> vector<1x128xf32>
    %405 = arith.addf %402, %404 : vector<1x128xf32>
    %406 = vector.extract_strided_slice %405 {offsets = [0, 0], sizes = [1, 32], strides = [1, 1]} : vector<1x128xf32> to vector<1x32xf32>
    %407 = arith.negf %406 : vector<1x32xf32>
    %408 = math.exp %407 : vector<1x32xf32>
    %cst_126 = arith.constant 1.000000e+00 : f32
    %409 = vector.broadcast %cst_126 : f32 to vector<1x32xf32>
    %410 = arith.addf %409, %408 : vector<1x32xf32>
    %411 = arith.divf %409, %410 : vector<1x32xf32>
    %412 = vector.extract_strided_slice %405 {offsets = [0, 32], sizes = [1, 32], strides = [1, 1]} : vector<1x128xf32> to vector<1x32xf32>
    %413 = arith.negf %412 : vector<1x32xf32>
    %414 = math.exp %413 : vector<1x32xf32>
    %cst_127 = arith.constant 1.000000e+00 : f32
    %415 = vector.broadcast %cst_127 : f32 to vector<1x32xf32>
    %416 = arith.addf %415, %414 : vector<1x32xf32>
    %417 = arith.divf %415, %416 : vector<1x32xf32>
    %418 = vector.extract_strided_slice %405 {offsets = [0, 64], sizes = [1, 32], strides = [1, 1]} : vector<1x128xf32> to vector<1x32xf32>
    %419 = math.tanh %418 : vector<1x32xf32>
    %420 = vector.extract_strided_slice %405 {offsets = [0, 96], sizes = [1, 32], strides = [1, 1]} : vector<1x128xf32> to vector<1x32xf32>
    %421 = arith.negf %420 : vector<1x32xf32>
    %422 = math.exp %421 : vector<1x32xf32>
    %cst_128 = arith.constant 1.000000e+00 : f32
    %423 = vector.broadcast %cst_128 : f32 to vector<1x32xf32>
    %424 = arith.addf %423, %422 : vector<1x32xf32>
    %425 = arith.divf %423, %424 : vector<1x32xf32>
    %426 = arith.mulf %417, %399 : vector<1x32xf32>
    %427 = arith.mulf %411, %419 : vector<1x32xf32>
    %428 = arith.addf %426, %427 : vector<1x32xf32>
    %429 = math.tanh %428 : vector<1x32xf32>
    %430 = arith.mulf %425, %429 : vector<1x32xf32>
    %c0_129 = arith.constant 0 : index
    %c0_130 = arith.constant 0 : index
    %431 = vector.load %arg11[%c0_129, %c0_130] : memref<32x32xf32, #tpu.memory_space<vmem>>, vector<32x32xf32>
    %cst_131 = arith.constant dense<0.000000e+00> : vector<1x32xf32>
    %432 = tpu.matmul %430, %431, %cst_131 {dimension_numbers = #tpu.dot_dimension_numbers<[1], [0], [0], [1], [0, 0, 1, 1], [], []>} : vector<1x32xf32>, vector<32x32xf32>, vector<1x32xf32> -> vector<1x32xf32>
    %c0_132 = arith.constant 0 : index
    %c0_133 = arith.constant 0 : index
    %433 = vector.load %arg12[%c0_132, %c0_133] : memref<1x32xf32, #tpu.memory_space<vmem>>, vector<1x32xf32>
    %434 = arith.addf %432, %433 : vector<1x32xf32>
    %cst_134 = arith.constant 0.000000e+00 : f32
    %435 = vector.broadcast %cst_134 : f32 to vector<1x32xf32>
    %436 = arith.maximumf %434, %435 : vector<1x32xf32>
    %c0_135 = arith.constant 0 : index
    %c0_136 = arith.constant 0 : index
    %437 = vector.load %arg13[%c0_135, %c0_136] : memref<32x4xf32, #tpu.memory_space<vmem>>, vector<32x4xf32>
    %cst_137 = arith.constant dense<0.000000e+00> : vector<1x4xf32>
    %438 = tpu.matmul %436, %437, %cst_137 {dimension_numbers = #tpu.dot_dimension_numbers<[1], [0], [0], [1], [0, 0, 1, 1], [], []>} : vector<1x32xf32>, vector<32x4xf32>, vector<1x4xf32> -> vector<1x4xf32>
    %c0_138 = arith.constant 0 : index
    %c0_139 = arith.constant 0 : index
    %439 = vector.load %arg14[%c0_138, %c0_139] : memref<1x4xf32, #tpu.memory_space<vmem>>, vector<1x4xf32>
    %440 = arith.addf %438, %439 : vector<1x4xf32>
    %c0_140 = arith.constant 0 : index
    %c0_141 = arith.constant 0 : index
    %c0_142 = arith.constant 0 : index
    %441 = vector.load %arg15[%c0_140, %c0_141, %c0_142] : memref<1x1x4xf32, #tpu.memory_space<vmem>>, vector<1x1x4xf32>
    %442 = vector.shape_cast %441 : vector<1x1x4xf32> to vector<1x4xf32>
    %443 = vector.shape_cast %440 : vector<1x4xf32> to vector<1x1x4xf32>
    tpu.vector_store %arg15[%c0_140, %c0_141, %c0_142], %443 {strides = array<i32>} : memref<1x1x4xf32, #tpu.memory_space<vmem>>, vector<1x1x4xf32>,
    return
  }
  func.func @transform_0(%arg0: i32) -> (i32, i32, i32) {
    %c0_i32 = arith.constant 0 : i32
    %c0_i32_0 = arith.constant 0 : i32
    %c0_i32_1 = arith.constant 0 : i32
    return %arg0, %c0_i32, %c0_i32_0 : i32, i32, i32
  }
  func.func @transform_1(%arg0: i32) -> (i32, i32, i32) {
    %c0_i32 = arith.constant 0 : i32
    %c0_i32_0 = arith.constant 0 : i32
    %c0_i32_1 = arith.constant 0 : i32
    return %arg0, %c0_i32, %c0_i32_0 : i32, i32, i32
  }
  func.func @transform_2(%arg0: i32) -> (i32, i32, i32) {
    %c0_i32 = arith.constant 0 : i32
    %c0_i32_0 = arith.constant 0 : i32
    %c0_i32_1 = arith.constant 0 : i32
    %c0_i32_2 = arith.constant 0 : i32
    return %c0_i32, %c0_i32_0, %c0_i32_1 : i32, i32, i32
  }
  func.func @transform_3(%arg0: i32) -> (i32, i32, i32) {
    %c0_i32 = arith.constant 0 : i32
    %c0_i32_0 = arith.constant 0 : i32
    %c0_i32_1 = arith.constant 0 : i32
    %c0_i32_2 = arith.constant 0 : i32
    return %c0_i32, %c0_i32_0, %c0_i32_1 : i32, i32, i32
  }
  func.func @transform_4(%arg0: i32) -> (i32, i32, i32) {
    %c0_i32 = arith.constant 0 : i32
    %c0_i32_0 = arith.constant 0 : i32
    %c0_i32_1 = arith.constant 0 : i32
    %c0_i32_2 = arith.constant 0 : i32
    return %c0_i32, %c0_i32_0, %c0_i32_1 : i32, i32, i32
  }
  func.func @transform_5(%arg0: i32) -> (i32, i32, i32) {
    %c0_i32 = arith.constant 0 : i32
    %c0_i32_0 = arith.constant 0 : i32
    %c0_i32_1 = arith.constant 0 : i32
    %c0_i32_2 = arith.constant 0 : i32
    return %c0_i32, %c0_i32_0, %c0_i32_1 : i32, i32, i32
  }
  func.func @transform_6(%arg0: i32) -> (i32, i32) {
    %c0_i32 = arith.constant 0 : i32
    %c0_i32_0 = arith.constant 0 : i32
    %c0_i32_1 = arith.constant 0 : i32
    return %c0_i32, %c0_i32_0 : i32, i32
  }
  func.func @transform_7(%arg0: i32) -> (i32, i32) {
    %c0_i32 = arith.constant 0 : i32
    %c0_i32_0 = arith.constant 0 : i32
    %c0_i32_1 = arith.constant 0 : i32
    return %c0_i32, %c0_i32_0 : i32, i32
  }
  func.func @transform_8(%arg0: i32) -> (i32, i32) {
    %c0_i32 = arith.constant 0 : i32
    %c0_i32_0 = arith.constant 0 : i32
    %c0_i32_1 = arith.constant 0 : i32
    return %c0_i32, %c0_i32_0 : i32, i32
  }
  func.func @transform_9(%arg0: i32) -> (i32, i32) {
    %c0_i32 = arith.constant 0 : i32
    %c0_i32_0 = arith.constant 0 : i32
    %c0_i32_1 = arith.constant 0 : i32
    return %c0_i32, %c0_i32_0 : i32, i32
  }
  func.func @transform_10(%arg0: i32) -> (i32, i32) {
    %c0_i32 = arith.constant 0 : i32
    %c0_i32_0 = arith.constant 0 : i32
    %c0_i32_1 = arith.constant 0 : i32
    return %c0_i32, %c0_i32_0 : i32, i32
  }
  func.func @transform_11(%arg0: i32) -> (i32, i32) {
    %c0_i32 = arith.constant 0 : i32
    %c0_i32_0 = arith.constant 0 : i32
    %c0_i32_1 = arith.constant 0 : i32
    return %c0_i32, %c0_i32_0 : i32, i32
  }
  func.func @transform_12(%arg0: i32) -> (i32, i32) {
    %c0_i32 = arith.constant 0 : i32
    %c0_i32_0 = arith.constant 0 : i32
    %c0_i32_1 = arith.constant 0 : i32
    return %c0_i32, %c0_i32_0 : i32, i32
  }
  func.func @transform_13(%arg0: i32) -> (i32, i32) {
    %c0_i32 = arith.constant 0 : i32
    %c0_i32_0 = arith.constant 0 : i32
    %c0_i32_1 = arith.constant 0 : i32
    return %c0_i32, %c0_i32_0 : i32, i32
  }
  func.func @transform_14(%arg0: i32) -> (i32, i32, i32) {
    %c0_i32 = arith.constant 0 : i32
    %c0_i32_0 = arith.constant 0 : i32
    %c0_i32_1 = arith.constant 0 : i32
    return %arg0, %c0_i32, %c0_i32_0 : i32, i32, i32
  }
}

</mosaic_0001>

<bundles_post_ra>
// kernel: _model_forward.1
= control target key start
LH: loop header
LB: loop body
LE: loop exit
PB: predicated region body
PF: predicated region fallthrough
CT: control target
= control target key end

     0   :  { %19 = vsyncpa [#allocation3], 0  ;;  %s3937_s0 = inlined_call_operand.vmem [shape: f32[2,16,32], index: 0, kind: input, shape index: {}]   ;;  %s3938_s1 = inlined_call_operand.vmem [shape: f32[2,16,16], index: 1, kind: input, shape index: {}]   ;;  %s3939_s2 = inlined_call_operand.vmem [shape: f32[3,32,32], index: 2, kind: input, shape index: {}]   ;;  %s3940_s3 = inlined_call_operand.vmem [shape: f32[3,32,4], index: 3, kind: input, shape index: {}]   ;;  %s3941_s4 = inlined_call_operand.vmem [shape: f32[3,32,4], index: 4, kind: input, shape index: {}]   ;;  %s3942_s5 = inlined_call_operand.vmem [shape: f32[3,1,32], index: 5, kind: input, shape index: {}]   ;;  %s3943_s6 = inlined_call_operand.vmem [shape: f32[4,32], index: 6, kind: input, shape index: {}]   ;;  %s3944_s7 = inlined_call_operand.vmem [shape: f32[64,128], index: 7, kind: input, shape index: {}]   ;;  %s3945_s8 = inlined_call_operand.vmem [shape: f32[32,128], index: 8, kind: input, shape index: {}]   ;;  %s3946_s9 = inlined_call_operand.vmem [shape: f32[1,128], index: 9, kind: input, shape index: {}]   ;;  %s3947_s10 = inlined_call_operand.vmem [shape: f32[32,32], index: 10, kind: input, shape index: {}]   ;;  %s3948_s11 = inlined_call_operand.vmem [shape: f32[1,32], index: 11, kind: input, shape index: {}]   ;;  %s3949_s12 = inlined_call_operand.vmem [shape: f32[32,4], index: 12, kind: input, shape index: {}]   ;;  %s3950_s13 = inlined_call_operand.vmem [shape: f32[1,4], index: 13, kind: input, shape index: {}]   ;;  %s3951_s14 = inlined_call_operand.hbm [shape: f32[2,1,4], index: 14, kind: output, shape index: {}]  }
   0x1   :  { %21 = vsyncpa [#allocation3 + $0x1], 0  ;;  %s3221_s29 = smov 0   ;;  %s3223_s30 = smov 0  }
   0x2   :  { %s3225_s15 = smov 0   ;;  %s3227_s16 = smov 0  }
   0x3 LB: > { %3957 = sst [smem:[#allocation5_spill]] %s3129_s29  ;;  %s3242_s17 = sadd.s32 4294967295, %s3141_s16   ;;  %s3141_s16 = sphi %s3227_s16, %s3970_s16   ;;  %s3137_s15 = sphi %s3225_s15, %s3972_s15   ;;  %s3133_s30 = sphi %s3223_s30, %s3974_s30   ;;  %s3129_s29 = sphi %s3221_s29, %s3973_s29  }
   0x4   : > { %3958 = sst [smem:[#allocation6_spill]] %s3137_s15  ;;  %s2788_s18 = sadd.s32 4294967294, %s3141_s16  }
   0x5   : > { %s3246_s19 = sadd.s32 1, %s3141_s16   ;;  %s338_s20 = sadd.s32 1, %s3137_s15 }
   0x6   : > { %3959 = sst [smem:[#allocation7_spill]] %s3246_s19  ;;  %s335_s21 = ssub.s32 %s3141_s16, %s3246_s19 }
   0x7   : > { %p348_p0 = scmp.ne.s32.totalorder %s3137_s15, %s3133_s30  ;;  %p336_p1 = scmp.eq.s32.totalorder %s335_s21, 0 }
   0x8   : > { %p349_p2 = scmp.eq.s32.totalorder %s3242_s17, 1  ;;  %p354_p3 = scmp.ne.s32.totalorder %s3133_s30, %s3129_s29 }
   0x9   : > { %p355_p4 = scmp.eq.s32.totalorder %s2788_s18, 1  ;;  %p2791_p7 = scmp.ge.s32.totalorder %s3141_s16, 1 }
   0xa   : > { %s3257_s22 = scalar_select %p336_p1, %s3137_s15, %s338_s20  }
   0xb   : > { %p3259_p5 = por %p349_p2, %p348_p0  ;;  %p3263_p6 = por %p355_p4, %p354_p3 }
   0xc   : > { %3960 = sst [smem:[#allocation8_spill]] %s3257_s22  ;;  %p425_p8 = scmp.lt.s32.totalorder %s3141_s16, 3 }
   0xd   : > { %s3962_s24 = scalar_select %p3263_p6, 1, 0 }
   0xe   : > { %p426_p9 = pnand %p2791_p7, %p425_p8 }
   0xf   : > { %3963 = sst [smem:[#allocation9_spill]] %s3962_s24  ;;  %p475_p10 = scmp.lt.s32.totalorder (!%p426_p9), %s3242_s17, 1 }
  0x10   : > { %429 = sbr.rel (%p426_p9) target bundleno = 6541 (0x198d), region = 76  ;;  %s3144_s20 = smov (!%p426_p9), 32  }
  0x11   : > { %s473_s15 = sand.u32 (!%p426_p9), 1, %s3133_s30   ;;  %s2717_s26 = scalar_lea.hbm (!%p426_p9), %s3951_s14, %s3242_s17 }
  0x12   : > { %s2709_s24 = scalar_lea.sflag (!%p426_p9), [#allocation3], %s473_s15  ;;  %s3099_s21 = scalar_lea.hbm (!%p426_p9), %s3951_s14, 2 }
  0x15   : > { %v504_v0 = vld [vmem:[%s3939_s2 + $0x18] sm:$0xff]  ;;  %v503_v1 = vld [vmem:[%s3939_s2 + $0x10] sm:$0xff]  ;;  %v502_v2 = vld [vmem:[%s3939_s2 + $0x8] sm:$0xff]  ;;  %s3286_s25 = scalar_select %p475_p10, %s3242_s17, 1  ;;  %vm505_vm0 = vcmask 261120   ;;  %v490_v32 = vlaneseq  ;;  %vm769_vm3 = vcmask 130048  }
  0x16   : > { %524 = vmatpush.msra.mxu0 %v504_v0  ;;  %v538_v3 = vld [vmem:[%s3940_s3 + $0x18] sm:$0xff]  ;;  %v537_v5 = vld [vmem:[%s3940_s3 + $0x10] sm:$0xff]  ;;  %v536_v7 = vld [vmem:[%s3940_s3 + $0x8] sm:$0xff] }
  0x17   : > { %v571_v4 = vld [vmem:[%s3941_s4 + $0x18] sm:$0xff]  ;;  %557 = vmatpush.msra.mxu1 %v538_v3  ;;  %v570_v6 = vld [vmem:[%s3941_s4 + $0x10] sm:$0xff]  ;;  %v569_v8 = vld [vmem:[%s3941_s4 + $0x8] sm:$0xff]  ;;  %s2888_s29 = sshll.u32 %s3286_s25, 4  ;;  %v3341_v33 = vshrl.u32 %v490_v32, 7  ;;  %s474_s25 = scalar_lea.vmem [#allocation2], %s473_s15 }
  0x18   : > { %584 = vmatpush.msra.mxu2 %v571_v4  ;;  %525 = vmatpush.msra.mxu0 %v503_v1  ;;  %v501_v9 = vld [vmem:[%s3939_s2] sm:$0xff]  ;;  %s479_s28 = scalar_lea.vmem %s3937_s0, %s2888_s29  ;;  %s484_s27 = scalar_lea.vmem %s3938_s1, %s2888_s29 }
  0x19   : > { %558 = vmatpush.msra.mxu1 %v537_v5  ;;  %v485_v10 = vld [vmem:[%s479_s28] sm:$0xff]  ;;  %v486_v11 = vld [vmem:[%s479_s28 + $0x8] sm:$0xff]  ;;  %2934 = vset.pattern.permute.xlu2 %v3341_v33  ;;  %v3346_v36 = vadd.s32 8, %v3341_v33  ;;  %s2719_s28 = sshll.u32 %s474_s25, 4  ;;  %s2720_s28 = int_to_ptr.vmem [resolvable:$true] %s2719_s28 }
  0x1a   : > { %585 = vmatpush.msra.mxu2 %v570_v6  ;;  %526 = vmatpush.msra.mxu0 %v502_v2  ;;  %v535_v12 = vld [vmem:[%s3940_s3] sm:$0xff]  ;;  %v3359_v51 = vld [vmem:[%s484_s27 + $0x8] sm:$0xff] }
  0x1b   : > { %559 = vmatpush.msra.mxu1 %v536_v7  ;;  %v568_v13 = vld [vmem:[%s3941_s4] sm:$0xff]  ;;  %2932 = vset.pattern.permute.xlu1 %v3341_v33  ;;  %vm756_vm1 = vcmp.gt.f32.partialorder %v3359_v51, 0.0 }
  0x1c   : > { %586 = vmatpush.msra.mxu2 %v569_v8  ;;  %527 = vmatpush.msra.mxu0 %v501_v9  ;;  %v489_v15 = vld [vmem:[%s3943_s6] sm:$0xf] }
  0x1d   : > { %2798 = vmatmul.msk.f32.vlgmr.msra.gmra.mxu0 %vm505_vm0, %v485_v10  ;;  %560 = vmatpush.msra.mxu1 %v535_v12  ;;  %v860_v16 = vrot.slane %v489_v15, 2  ;;  %v861_v17 = vrot.slane %v489_v15, 3  ;;  %v859_v18 = vrot.slane %v489_v15, 1  ;;  %v3322_v19 = vperm.slane %v489_v15, 0  ;;  %v3361_v55 = vld [vmem:[%s484_s27] sm:$0xff]  ;;  %s3145_s27 = smov 64  }
  0x1e   : > { %587 = vmatpush.msra.mxu2 %v568_v13  ;;  %vm755_vm5 = vcmp.gt.f32.partialorder %v3361_v55, 0.0 }
  0x1f   : > { %v3324_v20 = vperm.slane %v860_v16, 0  ;;  %v3326_v21 = vperm.slane %v861_v17, 0  ;;  %v3333_v26 = vperm.slane %v859_v18, 0 }
  0x25   : > { %2799 = vmatmul.msk.f32.gmra.mxu0 %vm505_vm0, %v486_v11 }
  0x9a   : > { %v529_v14 = vpop.f32.mrf.mxu0 }
  0x9b   : > { %2800 = vmatmul.msk.f32.vlgmr.msra.gmra.mxu1 %vm505_vm0, %v529_v14  ;;  %2802 = vmatmul.msk.f32.vlgmr.msra.gmra.mxu2 %vm505_vm0, %v529_v14  ;;  %v870_v27 = vmul.f32 %v3322_v19, %v529_v14  ;;  %v874_v28 = vmul.f32 %v3324_v20, %v529_v14  ;;  %v876_v29 = vmul.f32 %v3326_v21, %v529_v14 }
  0x9c   : > { %v872_v31 = vmul.f32 %v3333_v26, %v529_v14 }
  0xa2   : > { %v532_v22 = vpop.f32.mrf.mxu0 }
  0xa3   : > { %2801 = vmatmul.msk.f32.gmra.mxu1 %vm505_vm0, %v532_v22  ;;  %2803 = vmatmul.msk.f32.gmra.mxu2 %vm505_vm0, %v532_v22  ;;  %v871_v23 = vmul.f32 %v3322_v19, %v532_v22  ;;  %v875_v24 = vmul.f32 %v3324_v20, %v532_v22  ;;  %v877_v25 = vmul.f32 %v3326_v21, %v532_v22 }
  0xa4   : > { %v873_v30 = vmul.f32 %v3333_v26, %v532_v22 }
  0xa5   : > { %898 = vmatpush.msra.mxu3 %v871_v23  ;;  %956 = vmatpush.msrb.mxu0 %v875_v24 }
  0xa6   : > { %985 = vmatpush.msrb.mxu1 %v877_v25 }
  0xa7   : > { %899 = vmatpush.msra.mxu3 %v870_v27  ;;  %957 = vmatpush.msrb.mxu0 %v874_v28 }
  0xa8   : > { %986 = vmatpush.msrb.mxu1 %v876_v29 }
  0xa9   : > { %927 = vmatpush.msrb.mxu3 %v873_v30 }
  0xab   : > { %928 = vmatpush.msrb.mxu3 %v872_v31 }
 0x118   : > { %v562_v41 = vpop.f32.mrf.mxu1 }
 0x11e   : > { %v589_v34 = vpop.f32.mrf.mxu2 }
 0x11f   : > { %627 = vxpose.xlu0.b32.start [1/2] (short) (narrow) %v589_v34, 8 }
 0x120   : > { %v565_v43 = vpop.f32.mrf.mxu1 }
 0x126   : > { %v592_v35 = vpop.f32.mrf.mxu2 }
 0x127   : > { %628 = vxpose.xlu0.b32.end [2/2] (short) (narrow) %v592_v35, 8 }
 0x18e   : > { %2935 = vset.pattern.permute.xlu0 %v3346_v36 }
 0x1c3   : > { %v643_v37 = vpop.trf.xlu0 }
 0x1c4   : > { %v672_v38 = vperm.slane %v643_v37, 1  ;;  %v659_v39 = vperm.slane %v643_v37, 0  ;;  %v685_v40 = vperm.slane %v643_v37, 2  ;;  %v698_v42 = vperm.slane %v643_v37, 3 }
 0x1c6   : > { %683 = vperm.xlu0 %2935, %v672_v38   ;;  %677 = vperm.xlu2 %2934, %v672_v38  }
 0x1c7   : > { %664 = vperm.xlu1 %2932, %v659_v39  }
 0x1cf   : > { %2933 = vset.pattern.permute.xlu1 %v3346_v36 }
 0x1d7   : > { %670 = vperm.xlu1 %2933, %v659_v39  }
 0x1df   : > { %2936 = vset.pattern.permute.xlu1 %v3341_v33 }
 0x1e7   : > { %690 = vperm.xlu1 %2936, %v685_v40  }
 0x1ec   : > { %595 = vxpose.xlu2.b32.start [1/2] (short) (narrow) %v562_v41, 8 }
 0x1ef   : > { %703 = vperm.xlu1 %2936, %v698_v42  }
 0x1f4   : > { %596 = vxpose.xlu2.b32.end [2/2] (short) (narrow) %v565_v43, 8 }
 0x1f7   : > { %2937 = vset.pattern.permute.xlu1 %v3346_v36 }
 0x1ff   : > { %696 = vperm.xlu1 %2937, %v685_v40  }
 0x207   : > { %709 = vperm.xlu1 %2937, %v698_v42  }
 0x220   : > { %v678_v48 = vpop.permute.xlu2 %677 }
 0x238   : > { %v684_v11 = vpop.permute.xlu0 %683 }
 0x239   : > { %v665_v44 = vpop.permute.xlu1 %664 }
 0x249   : > { %v671_v45 = vpop.permute.xlu1 %670 }
 0x259   : > { %v691_v46 = vpop.permute.xlu1 %690 }
 0x261   : > { %v704_v47 = vpop.permute.xlu1 %703 }
 0x271   : > { %v3352_v49 = vpop.permute.xlu1 %696 }
 0x279   : > { %v710_v59 = vpop.permute.xlu1 %709 }
 0x285   : > { %v611_v50 = vpop.trf.xlu2 }
 0x286   : > { %v712_v52 = vrot.slane %v611_v50, 1  ;;  %v714_v53 = vrot.slane %v611_v50, 3  ;;  %v715_v54 = vperm.slane %v611_v50, 0  ;;  %v713_v13 = vrot.slane %v611_v50, 2 }
 0x288   : > { %v716_v56 = vperm.slane %v712_v52, 0  ;;  %v718_v57 = vperm.slane %v714_v53, 0  ;;  %v724_v58 = vadd.f32 %v715_v54, %v671_v45  ;;  %v723_v60 = vadd.f32 %v715_v54, %v665_v44 }
 0x289   : > { %v717_v17 = vperm.slane %v713_v13, 0 }
 0x28a   : > { %vm732_vm2 = vcmp.gt.f32.partialorder %v724_v58, 0.0  ;;  %v740_v61 = vmul.f32 0.2, %v724_v58  ;;  %v730_v62 = vadd.f32 %v718_v57, %v710_v59  ;;  %v725_v63 = vadd.f32 %v716_v56, %v678_v48 }
 0x28b   : > { %vm731_vm4 = vcmp.gt.f32.partialorder %v723_v60, 0.0  ;;  %v739_v0 = vmul.f32 0.2, %v723_v60  ;;  %v726_v15 = vadd.f32 %v716_v56, %v684_v11  ;;  %v727_v24 = vadd.f32 %v717_v17, %v691_v46 }
 0x28c   : > { %v748_v1 = vsel %vm732_vm2, %v724_v58, %v740_v61  ;;  %vm738_vm6 = vcmp.gt.f32.partialorder %v730_v62, 0.0  ;;  %v746_v2 = vmul.f32 0.2, %v730_v62  ;;  %v741_v5 = vmul.f32 0.2, %v725_v63 }
 0x28d   : > { %v762_v3 = vsel %vm756_vm1, %v748_v1, -1e+09  ;;  %v747_v4 = vsel %vm731_vm4, %v723_v60, %v739_v0  ;;  %vm733_vm7 = vcmp.gt.f32.partialorder %v725_v63, 0.0  ;;  %v742_v18 = vmul.f32 0.2, %v726_v15 }
 0x28e   : > { %v773_v6 = vsel %vm769_vm3, %v762_v3, -inf  ;;  %v761_v7 = vsel %vm755_vm5, %v747_v4, -1e+09  ;;  %v754_v8 = vsel %vm738_vm6, %v730_v62, %v746_v2  ;;  %v749_v14 = vsel %vm733_vm7, %v725_v63, %v741_v5 }
 0x28f   : > { %774 = vmax.xlane.f32.xlu2 %v773_v6  ;;  %v770_v9 = vsel %vm769_vm3, %v761_v7, -inf  ;;  %v3373_v10 = vsel %vm756_vm1, %v754_v8, -1e+09  ;;  %v763_v16 = vsel %vm755_vm5, %v749_v14, -1e+09  ;;  %vm734_vm8 = vcmp.gt.f32.partialorder %v726_v15, 0.0 }
 0x290   : > { %771 = vmax.xlane.f32.xlu1 %v770_v9  ;;  %v791_v12 = vsel %vm769_vm3, %v3373_v10, -inf  ;;  %v776_v22 = vsel %vm769_vm3, %v763_v16, -inf  ;;  %v750_v23 = vsel %vm734_vm8, %v726_v15, %v742_v18  ;;  %v743_v27 = vmul.f32 0.2, %v727_v24 }
 0x291   : > { %792 = vmax.xlane.f32.xlu0 %v791_v12  ;;  %v764_v25 = vsel %vm756_vm1, %v750_v23, -1e+09  ;;  %vm735_vm9 = vcmp.gt.f32.partialorder %v727_v24, 0.0  ;;  %v729_v30 = vadd.f32 %v718_v57, %v704_v47  ;;  %v728_v38 = vadd.f32 %v717_v17, %v3352_v49 }
 0x292   : > { %v779_v28 = vsel %vm769_vm3, %v764_v25, -inf  ;;  %v751_v29 = vsel %vm735_vm9, %v727_v24, %v743_v27 }
 0x293   : > { %v765_v31 = vsel %vm755_vm5, %v751_v29, -1e+09  ;;  %v745_v34 = vmul.f32 0.2, %v729_v30  ;;  %vm737_vm10 = vcmp.gt.f32.partialorder %v729_v30, 0.0  ;;  %vm736_vm11 = vcmp.gt.f32.partialorder %v728_v38, 0.0 }
 0x294   : > { %v782_v35 = vsel %vm769_vm3, %v765_v31, -inf  ;;  %v744_v40 = vmul.f32 0.2, %v728_v38 }
 0x295   : > { %v753_v37 = vsel %vm737_vm10, %v729_v30, %v745_v34 }
 0x296   : > { %v767_v39 = vsel %vm755_vm5, %v753_v37, -1e+09  ;;  %v752_v42 = vsel %vm736_vm11, %v728_v38, %v744_v40 }
 0x297   : > { %v788_v41 = vsel %vm769_vm3, %v767_v39, -inf  ;;  %v766_v43 = vsel %vm756_vm1, %v752_v42, -1e+09 }
 0x298   : > { %777 = vmax.xlane.f32.xlu1 %v776_v22  ;;  %v785_v44 = vsel %vm769_vm3, %v766_v43, -inf }
 0x2a0   : > { %780 = vmax.xlane.f32.xlu1 %v779_v28 }
 0x2a8   : > { %783 = vmax.xlane.f32.xlu1 %v782_v35 }
 0x2b0   : > { %789 = vmax.xlane.f32.xlu1 %v788_v41 }
 0x2b8   : > { %786 = vmax.xlane.f32.xlu1 %v785_v44 }
 0x302   : > { %v775_v45 = vpop.xlane.xlu2 %774 }
 0x303   : > { %v772_v46 = vpop.xlane.xlu1 %771  ;;  %v795_v48 = vsub.f32 %v762_v3, %v775_v45 }
 0x304   : > { %v794_v47 = vsub.f32 %v761_v7, %v772_v46  ;;  %v793_v4 = vpop.xlane.xlu0 %792 }
 0x305   : > { %v804_v50 = vmul.f32 1.442695, %v795_v48  ;;  %v801_v8 = vsub.f32 %v3373_v10, %v793_v4 }
 0x306   : > { %v802_v49 = vmul.f32 1.442695, %v794_v47 }
 0x307   : > { %v816_v12 = vmul.f32 1.442695, %v801_v8 }
 0x308   : > { %2947 = vpow2.f32 %v802_v49 }
 0x309   : > { %2949 = vpow2.f32 %v804_v50 }
 0x30b   : > { %v778_v52 = vpop.xlane.xlu1 %777 }
 0x30c   : > { %v796_v54 = vsub.f32 %v763_v16, %v778_v52 }
 0x30e   : > { %v2948_v53 = vpop.eup %2947  ;;  %v806_v57 = vmul.f32 1.442695, %v796_v54 }
 0x30f   : > { %v818_v56 = vsel %vm769_vm3, %v2948_v53, 0.0  ;;  %v2950_v59 = vpop.eup %2949 }
 0x310   : > { %819 = vadd.xlane.f32.xlu1 %v818_v56  ;;  %2951 = vpow2.f32 %v806_v57  ;;  %v821_v61 = vsel %vm769_vm3, %v2950_v59, 0.0 }
 0x313   : > { %v781_v58 = vpop.xlane.xlu1 %780 }
 0x314   : > { %v797_v60 = vsub.f32 %v764_v25, %v781_v58 }
 0x316   : > { %v808_v62 = vmul.f32 1.442695, %v797_v60  ;;  %v2952_v0 = vpop.eup %2951 }
 0x317   : > { %v824_v2 = vsel %vm769_vm3, %v2952_v0, 0.0 }
 0x318   : > { %822 = vadd.xlane.f32.xlu1 %v821_v61  ;;  %2953 = vpow2.f32 %v808_v62 }
 0x31b   : > { %v784_v63 = vpop.xlane.xlu1 %783 }
 0x31c   : > { %v798_v1 = vsub.f32 %v765_v31, %v784_v63 }
 0x31e   : > { %v810_v3 = vmul.f32 1.442695, %v798_v1  ;;  %v2954_v6 = vpop.eup %2953 }
 0x31f   : > { %v827_v11 = vsel %vm769_vm3, %v2954_v6, 0.0 }
 0x320   : > { %825 = vadd.xlane.f32.xlu1 %v824_v2  ;;  %2955 = vpow2.f32 %v810_v3 }
 0x323   : > { %v790_v5 = vpop.xlane.xlu1 %789 }
 0x324   : > { %v800_v7 = vsub.f32 %v767_v39, %v790_v5 }
 0x326   : > { %v814_v9 = vmul.f32 1.442695, %v800_v7  ;;  %v2956_v14 = vpop.eup %2955 }
 0x327   : > { %v830_v18 = vsel %vm769_vm3, %v2956_v14, 0.0 }
 0x328   : > { %2957 = vpow2.f32 %v814_v9  ;;  %828 = vadd.xlane.f32.xlu1 %v827_v11 }
 0x329   : > { %2959 = vpow2.f32 %v816_v12 }
 0x32b   : > { %v787_v13 = vpop.xlane.xlu1 %786 }
 0x32c   : > { %v799_v15 = vsub.f32 %v766_v43, %v787_v13 }
 0x32e   : > { %v2958_v16 = vpop.eup %2957  ;;  %v812_v17 = vmul.f32 1.442695, %v799_v15 }
 0x32f   : > { %v836_v22 = vsel %vm769_vm3, %v2958_v16, 0.0  ;;  %v2960_v10 = vpop.eup %2959 }
 0x330   : > { %2961 = vpow2.f32 %v812_v17  ;;  %831 = vadd.xlane.f32.xlu1 %v830_v18  ;;  %837 = vadd.xlane.f32.xlu2 %v836_v22  ;;  %v839_v24 = vsel %vm769_vm3, %v2960_v10, 0.0  ;;  %v2818_v17 = vld [vmem:[%s3939_s2 + $0x30] sm:$0xff]  ;;  %v2817_v18 = vld [vmem:[%s3939_s2 + $0x28] sm:$0xff]  ;;  %v3430_v22 = vand.u32 127, %v490_v32 }
 0x332   : > { %vm1055_vm12 = vcmp.lt.s32.totalorder %v3430_v22, %v3346_v36  ;;  %vm1054_vm1 = vcmp.lt.s32.totalorder %v3430_v22, %v3341_v33 }
 0x336   : > { %v2962_v23 = vpop.eup %2961 }
 0x337   : > { %v833_v25 = vsel %vm769_vm3, %v2962_v23, 0.0 }
 0x338   : > { %840 = vadd.xlane.f32.xlu1 %v839_v24  ;;  %834 = vadd.xlane.f32.xlu0 %v833_v25  ;;  %v3143_v24 = vmov 0.0  }
 0x383   : > { %v820_v27 = vpop.xlane.xlu1 %819 }
 0x384   : > { %2963 = vrcp.f32 %v820_v27 }
 0x38a   : > { %v2964_v28 = vpop.eup %2963 }
 0x38b   : > { %v823_v29 = vpop.xlane.xlu1 %822  ;;  %v850_v30 = vmul.f32 %v2964_v28, %v2948_v53 }
 0x38c   : > { %2965 = vrcp.f32 %v823_v29  ;;  %v2816_v29 = vld [vmem:[%s3939_s2 + $0x20] sm:$0xff] }
 0x38d   : > { %2804 = vmatmul.msk.f32.vlgmr.msra.gmra.mxu3 %vm769_vm3, %v850_v30  ;;  %v2831_v30 = vld [vmem:[%s3941_s4 + $0x38] sm:$0xff] }
 0x38e   : > { %1240 = vmatpush.msra.mxu0 %v2831_v30 }
 0x392   : > { %v2966_v31 = vpop.eup %2965 }
 0x393   : > { %v826_v34 = vpop.xlane.xlu1 %825  ;;  %v851_v35 = vmul.f32 %v2966_v31, %v2950_v59  ;;  %v2830_v31 = vld [vmem:[%s3941_s4 + $0x30] sm:$0xff] }
 0x394   : > { %2967 = vrcp.f32 %v826_v34  ;;  %v2825_v34 = vld [vmem:[%s3940_s3 + $0x38] sm:$0xff]  ;;  %1241 = vmatpush.msra.mxu0 %v2830_v31 }
 0x395   : > { %2805 = vmatmul.msk.f32.gmra.mxu3 %vm769_vm3, %v851_v35  ;;  %v2824_v35 = vld [vmem:[%s3940_s3 + $0x30] sm:$0xff] }
 0x396   : > { %1212 = vmatpush.msra.mxu3 %v2825_v34 }
 0x398   : > { %1213 = vmatpush.msra.mxu3 %v2824_v35 }
 0x39a   : > { %v2968_v37 = vpop.eup %2967 }
 0x39b   : > { %v829_v38 = vpop.xlane.xlu1 %828  ;;  %v852_v39 = vmul.f32 %v2968_v37, %v2952_v0  ;;  %v2943_v0 = vld [vmem:[%s3942_s5] ss:$0 sm:$0xff]  ;;  %v2829_v37 = vld [vmem:[%s3941_s4 + $0x28] sm:$0xff] }
 0x39c   : > { %2969 = vrcp.f32 %v829_v38  ;;  %v2823_v38 = vld [vmem:[%s3940_s3 + $0x28] sm:$0xff]  ;;  %1242 = vmatpush.msra.mxu0 %v2829_v37 }
 0x39d   : > { %2806 = vmatmul.msk.f32.vlgmr.msrb.gmra.mxu3 %vm769_vm3, %v852_v39  ;;  %v2828_v39 = vld [vmem:[%s3941_s4 + $0x20] sm:$0xff] }
 0x39e   : > { %1214 = vmatpush.msra.mxu3 %v2823_v38  ;;  %1243 = vmatpush.msra.mxu0 %v2828_v39 }
 0x3a2   : > { %v2970_v40 = vpop.eup %2969 }
 0x3a3   : > { %v838_v41 = vpop.xlane.xlu2 %837  ;;  %v832_v42 = vpop.xlane.xlu1 %831  ;;  %v853_v43 = vmul.f32 %v2970_v40, %v2954_v6 }
 0x3a4   : > { %2971 = vrcp.f32 %v838_v41 }
 0x3a5   : > { %2973 = vrcp.f32 %v832_v42  ;;  %2807 = vmatmul.msk.f32.gmra.mxu3 %vm769_vm3, %v853_v43 }
 0x3aa   : > { %v2972_v44 = vpop.eup %2971 }
 0x3ab   : > { %v2974_v45 = vpop.eup %2973  ;;  %v835_v46 = vpop.xlane.xlu0 %834  ;;  %v856_v48 = vmul.f32 %v2972_v44, %v2958_v16  ;;  %v2819_v16 = vld [vmem:[%s3939_s2 + $0x38] sm:$0xff] }
 0x3ac   : > { %v841_v47 = vpop.xlane.xlu1 %840  ;;  %2975 = vrcp.f32 %v835_v46  ;;  %v854_v49 = vmul.f32 %v2974_v45, %v2956_v14  ;;  %1178 = vmatpush.msrb.mxu2 %v2819_v16 }
 0x3ad   : > { %2977 = vrcp.f32 %v841_v47  ;;  %2810 = vmatmul.msk.f32.vlgmr.msrb.gmra.mxu1 %vm769_vm3, %v856_v48 }
 0x3ae   : > { %2808 = vmatmul.msk.f32.vlgmr.msrb.gmra.mxu0 %vm769_vm3, %v854_v49  ;;  %1179 = vmatpush.msrb.mxu2 %v2818_v17 }
 0x3b0   : > { %1180 = vmatpush.msrb.mxu2 %v2817_v18 }
 0x3b2   : > { %v2976_v50 = vpop.eup %2975  ;;  %1181 = vmatpush.msrb.mxu2 %v2816_v29 }
 0x3b3   : > { %v2978_v52 = vpop.eup %2977  ;;  %v855_v53 = vmul.f32 %v2976_v50, %v2962_v23 }
 0x3b4   : > { %v857_v54 = vmul.f32 %v2978_v52, %v2960_v10 }
 0x3b6   : > { %2809 = vmatmul.msk.f32.gmra.mxu0 %vm769_vm3, %v855_v53  ;;  %2811 = vmatmul.msk.f32.gmra.mxu1 %vm769_vm3, %v857_v54 }
 0x410   : > { %v901_v56 = vpop.f32.mrf.mxu3 }
 0x418   : > { %v904_v57 = vpop.f32.mrf.mxu3 }
 0x420   : > { %v930_v58 = vpop.f32.mrf.mxu3 }
 0x421   : > { %v994_v59 = vadd.f32 %v930_v58, %v901_v56 }
 0x428   : > { %v933_v1 = vpop.f32.mrf.mxu3 }
 0x429   : > { %v995_v3 = vadd.f32 %v933_v1, %v904_v57 }
 0x42a   : > { %v988_v61 = vpop.f32.mrf.mxu1 }
 0x42b   : > { %v959_v60 = vpop.f32.mrf.mxu0 }
 0x42c   : > { %v996_v62 = vadd.f32 %v994_v59, %v959_v60  ;;  %v2822_v60 = vld [vmem:[%s3940_s3 + $0x20] sm:$0xff] }
 0x42d   : > { %1215 = vmatpush.msra.mxu3 %v2822_v60 }
 0x42e   : > { %v3410_v63 = vadd.f32 %v996_v62, %v988_v61 }
 0x430   : > { %v1000_v2 = vmax.f32 %v3410_v63, 0.0 }
 0x432   : > { %v1006_v4 = vmul.f32 %v2943_v0, %v1000_v2 }
 0x433   : > { %v962_v5 = vpop.f32.mrf.mxu0  ;;  %v991_v8 = vpop.f32.mrf.mxu1 }
 0x434   : > { %v997_v6 = vadd.f32 %v995_v3, %v962_v5  ;;  %v1008_v7 = vsel %vm505_vm0, %v1006_v4, 0.0 }
 0x435   : > { %1009 = vadd.xlane.f32.xlu2 %v1008_v7 }
 0x436   : > { %v999_v9 = vadd.f32 %v997_v6, %v991_v8 }
 0x438   : > { %v1001_v11 = vmax.f32 %v999_v9, 0.0 }
 0x43a   : > { %v1007_v12 = vmul.f32 %v2943_v0, %v1001_v11 }
 0x43c   : > { %v1011_v13 = vsel %vm505_vm0, %v1007_v12, 0.0 }
 0x43d   : > { %1012 = vadd.xlane.f32.xlu0 %v1011_v13 }
 0x4a8   : > { %v1010_v14 = vpop.xlane.xlu2 %1009 }
 0x4a9   : > { %1017 = vxpose.xlu1.b32.start [1/2] (short) (narrow) %v1010_v14, 8 }
 0x4b0   : > { %v1013_v15 = vpop.xlane.xlu0 %1012 }
 0x4b1   : > { %1018 = vxpose.xlu1.b32.end [2/2] (short) (narrow) %v1013_v15, 8  ;;  %2979 = vtanh.f32 %v1013_v15 }
 0x4b2   : > { %2981 = vtanh.f32 %v1010_v14 }
 0x4b7   : > { %v2980_v40 = vpop.eup %2979 }
 0x4b8   : > { %v2982_v41 = vpop.eup %2981  ;;  %v1079_v43 = vmul.f32 %v2980_v40, %v1001_v11 }
 0x4b9   : > { %v1078_v46 = vmul.f32 %v2982_v41, %v1000_v2 }
 0x54d   : > { %v1033_v10 = vpop.trf.xlu1 }
 0x54e   : > { %v1049_v23 = vperm.slane %v1033_v10, 0 }
 0x550   : > { %vm1051_vm13 = vcmp.gt.f32.partialorder %v1049_v23, %v1013_v15  ;;  %vm1053_vm14 = vcmp.eq.f32.partialorder %v1049_v23, %v1013_v15  ;;  %vm1052_vm15 = vcmp.eq.f32.partialorder %v1049_v23, %v1010_v14  ;;  %vm1050_vm4 = vcmp.gt.f32.partialorder %v1049_v23, %v1010_v14 }
 0x551   : > { %vm1057_vm2 = vmand %vm1053_vm14, %vm1055_vm12  ;;  %vm496_vm14 = vcmp.eq.s32.totalorder %v3346_v36, %v3430_v22 }
 0x552   : > { %vm1059_vm5 = vmor %vm1051_vm13, %vm1057_vm2  ;;  %vm495_vm13 = vcmp.eq.s32.totalorder %v3341_v33, %v3430_v22 }
 0x553   : > { %v2813_v32 = vsel %vm1059_vm5, 1.0, %v3143_v24  ;;  %vm1056_vm6 = vmand %vm1052_vm15, %vm1054_vm1  ;;  %v3531_v40 = vsel %vm495_vm13, 1.0, %v3143_v24 }
 0x554   : > { %v1067_v25 = vsel %vm769_vm3, %v2813_v32, 0.0  ;;  %vm1058_vm7 = vmor %vm1050_vm4, %vm1056_vm6 }
 0x555   : > { %1068 = vadd.xlane.f32.xlu0 %v1067_v25  ;;  %v2812_v27 = vsel %vm1058_vm7, 1.0, %v3143_v24 }
 0x556   : > { %v1064_v28 = vsel %vm769_vm3, %v2812_v27, 0.0 }
 0x557   : > { %1065 = vadd.xlane.f32.xlu2 %v1064_v28 }
 0x5c8   : > { %v1069_v42 = vpop.xlane.xlu0 %1068 }
 0x5c9   : > { %vm1071_vm8 = vcmp.lt.f32.partialorder %v1069_v42, 8.0  ;;  %v3534_v42 = vsel %vm496_vm14, 1.0, %v3143_v24 }
 0x5ca   : > { %v3471_v44 = vsel %vm1071_vm8, 1.0, %v3143_v24  ;;  %v1066_v45 = vpop.xlane.xlu2 %1065 }
 0x5cb   : > { %vm1070_vm9 = vcmp.lt.f32.partialorder %v1066_v45, 8.0  ;;  %v1081_v47 = vmul.f32 %v3471_v44, %v1079_v43  ;;  %vm1134_vm10 = vcmp.gt.f32.partialorder %v3471_v44, 0.0  ;;  %v1083_v45 = vmul.f32 %v3471_v44, %v3359_v51 }
 0x5cc   : > { %v3477_v48 = vsel %vm1070_vm9, 1.0, %v3143_v24 }
 0x5cd   : > { %v1080_v49 = vmul.f32 %v3477_v48, %v1078_v46  ;;  %v1124_v50 = vsel %vm505_vm0, %v1081_v47, 0.0  ;;  %vm1133_vm11 = vcmp.gt.f32.partialorder %v3477_v48, 0.0  ;;  %v1140_v52 = vsel %vm1134_vm10, %v1081_v47, -1e+30 }
 0x5ce   : > { %v1142_v56 = vsel %vm505_vm0, %v1140_v52, -inf  ;;  %v1082_v43 = vmul.f32 %v3477_v48, %v3361_v55  ;;  %v1119_v52 = vmul.f32 %v3477_v48, %v3531_v40  ;;  %v1120_v55 = vmul.f32 %v3471_v44, %v3534_v42 }
 0x5cf   : > { %2820 = vmatmul.msk.f32.vlgmr.msrb.gmra.mxu2 %vm505_vm0, %v1080_v49  ;;  %v1123_v53 = vsel %vm505_vm0, %v1080_v49, 0.0  ;;  %v1139_v54 = vsel %vm1133_vm11, %v1080_v49, -1e+30 }
 0x5d0   : > { %v3490_v57 = vadd.f32 %v1124_v50, %v1123_v53  ;;  %v1141_v58 = vsel %vm505_vm0, %v1139_v54, -inf }
 0x5d1   : > { %v3493_v59 = vmax.f32 %v1141_v58, %v1142_v56 }
 0x5d7   : > { %2821 = vmatmul.msk.f32.gmra.mxu2 %vm505_vm0, %v1081_v47 }
 0x652   : > { %v1183_v61 = vpop.f32.mrf.mxu2 }
 0x653   : > { %2826 = vmatmul.msk.f32.vlgmr.msra.gmra.mxu3 %vm505_vm0, %v1183_v61  ;;  %2832 = vmatmul.msk.f32.vlgmr.msra.gmra.mxu0 %vm505_vm0, %v1183_v61  ;;  %v1513_v3 = vmul.f32 %v1183_v61, %v3322_v19  ;;  %v1515_v4 = vmul.f32 %v1183_v61, %v3333_v26  ;;  %v1517_v5 = vmul.f32 %v1183_v61, %v3324_v20 }
 0x654   : > { %v1519_v6 = vmul.f32 %v1183_v61, %v3326_v21 }
 0x65a   : > { %v1186_v62 = vpop.f32.mrf.mxu2 }
 0x65b   : > { %2827 = vmatmul.msk.f32.gmra.mxu3 %vm505_vm0, %v1186_v62  ;;  %2833 = vmatmul.msk.f32.gmra.mxu0 %vm505_vm0, %v1186_v62  ;;  %v1514_v63 = vmul.f32 %v1186_v62, %v3322_v19  ;;  %v1516_v0 = vmul.f32 %v1186_v62, %v3333_v26  ;;  %v1518_v1 = vmul.f32 %v1186_v62, %v3324_v20 }
 0x65c   : > { %v1520_v2 = vmul.f32 %v1186_v62, %v3326_v21 }
 0x65d   : > { %1541 = vmatpush.msra.mxu1 %v1514_v63  ;;  %1570 = vmatpush.msra.mxu2 %v1516_v0 }
 0x65e   : > { %1599 = vmatpush.msrb.mxu3 %v1518_v1  ;;  %1628 = vmatpush.msrb.mxu0 %v1520_v2 }
 0x65f   : > { %1542 = vmatpush.msra.mxu1 %v1513_v3  ;;  %1571 = vmatpush.msra.mxu2 %v1515_v4 }
 0x660   : > { %1600 = vmatpush.msrb.mxu3 %v1517_v5  ;;  %1629 = vmatpush.msrb.mxu0 %v1519_v6 }
 0x6d0   : > { %v1245_v7 = vpop.f32.mrf.mxu0 }
 0x6d1   : > { %1283 = vxpose.xlu2.b32.start [1/2] (short) (narrow) %v1245_v7, 8 }
 0x6d6   : > { %v1217_v8 = vpop.f32.mrf.mxu3 }
 0x6d7   : > { %1251 = vxpose.xlu0.b32.start [1/2] (short) (narrow) %v1217_v8, 8 }
 0x6d8   : > { %v1248_v9 = vpop.f32.mrf.mxu0 }
 0x6d9   : > { %1284 = vxpose.xlu2.b32.end [2/2] (short) (narrow) %v1248_v9, 8 }
 0x6de   : > { %v1220_v11 = vpop.f32.mrf.mxu3 }
 0x6df   : > { %1252 = vxpose.xlu0.b32.end [2/2] (short) (narrow) %v1220_v11, 8 }
 0x73b   : > { %2938 = vset.pattern.permute.xlu2 %v3346_v36 }
 0x746   : > { %2939 = vset.pattern.permute.xlu0 %v3341_v33 }
 0x76a   : > { %v1299_v12 = vpop.trf.xlu2 }
 0x76b   : > { %v1341_v13 = vperm.slane %v1299_v12, 2  ;;  %v1328_v14 = vperm.slane %v1299_v12, 1  ;;  %v1315_v15 = vperm.slane %v1299_v12, 0  ;;  %v1354_v16 = vperm.slane %v1299_v12, 3 }
 0x76d   : > { %1352 = vperm.xlu1 %2937, %v1341_v13   ;;  %1339 = vperm.xlu2 %2938, %v1328_v14  }
 0x76e   : > { %1333 = vperm.xlu0 %2939, %v1328_v14  }
 0x776   : > { %1346 = vperm.xlu0 %2939, %v1341_v13  }
 0x77b   : > { %v3516_v17 = vpop.trf.xlu0 }
 0x77c   : > { %v1368_v27 = vrot.slane %v3516_v17, 1  ;;  %v1369_v29 = vrot.slane %v3516_v17, 2  ;;  %v1371_v30 = vperm.slane %v3516_v17, 0  ;;  %v1370_v37 = vrot.slane %v3516_v17, 3 }
 0x77e   : > { %1320 = vperm.xlu0 %2939, %v1315_v15   ;;  %v1372_v31 = vperm.slane %v1368_v27, 0  ;;  %v1373_v34 = vperm.slane %v1369_v29, 0  ;;  %v1374_v50 = vperm.slane %v1370_v37, 0 }
 0x786   : > { %1359 = vperm.xlu0 %2939, %v1354_v16  }
 0x78e   : > { %2940 = vset.pattern.permute.xlu0 %v3346_v36 }
 0x796   : > { %1326 = vperm.xlu0 %2940, %v1315_v15  }
 0x79e   : > { %1365 = vperm.xlu0 %2940, %v1354_v16  }
 0x7c0   : > { %1084 = vxpose.xlu0.b32.start [1/2] (short) (narrow) %v3477_v48, 8  ;;  %v2848_v48 = vld [vmem:[%s3939_s2 + $0x48] sm:$0xff] }
 0x7c7   : > { %v1340_v47 = vpop.permute.xlu2 %1339 }
 0x7c8   : > { %1085 = vxpose.xlu0.b32.end [2/2] (short) (narrow) %v3471_v44, 8  ;;  %v1382_v60 = vadd.f32 %v1372_v31, %v1340_v47 }
 0x7ca   : > { %v1398_v5 = vmul.f32 0.2, %v1382_v60  ;;  %vm1390_vm6 = vcmp.gt.f32.partialorder %v1382_v60, 0.0 }
 0x7cc   : > { %v1406_v13 = vsel %vm1390_vm6, %v1382_v60, %v1398_v5 }
 0x7df   : > { %v1353_v9 = vpop.permute.xlu1 %1352 }
 0x7e0   : > { %v1334_v18 = vpop.permute.xlu0 %1333  ;;  %v1384_v12 = vadd.f32 %v1373_v34, %v1353_v9 }
 0x7e1   : > { %v1381_v35 = vadd.f32 %v1372_v31, %v1334_v18 }
 0x7e2   : > { %vm1392_vm9 = vcmp.gt.f32.partialorder %v1384_v12, 0.0 }
 0x7e3   : > { %v1397_v49 = vmul.f32 0.2, %v1381_v35  ;;  %vm1389_vm15 = vcmp.gt.f32.partialorder %v1381_v35, 0.0 }
 0x7e5   : > { %v1405_v62 = vsel %vm1389_vm15, %v1381_v35, %v1397_v49 }
 0x7e8   : > { %v1347_v10 = vpop.permute.xlu0 %1346 }
 0x7e9   : > { %v1383_v38 = vadd.f32 %v1373_v34, %v1347_v10  ;;  %v1400_v10 = vmul.f32 0.2, %v1384_v12 }
 0x7eb   : > { %v1399_v53 = vmul.f32 0.2, %v1383_v38  ;;  %vm1391_vm2 = vcmp.gt.f32.partialorder %v1383_v38, 0.0  ;;  %v1408_v29 = vsel %vm1392_vm9, %v1384_v12, %v1400_v10 }
 0x7ed   : > { %v1407_v0 = vsel %vm1391_vm2, %v1383_v38, %v1399_v53 }
 0x7f0   : > { %v1321_v23 = vpop.permute.xlu0 %1320 }
 0x7f1   : > { %v1379_v39 = vadd.f32 %v1371_v30, %v1321_v23 }
 0x7f3   : > { %v1395_v54 = vmul.f32 0.2, %v1379_v39  ;;  %vm1387_vm4 = vcmp.gt.f32.partialorder %v1379_v39, 0.0 }
 0x7f5   : > { %v1403_v1 = vsel %vm1387_vm4, %v1379_v39, %v1395_v54 }
 0x7f8   : > { %v1360_v32 = vpop.permute.xlu0 %1359 }
 0x7f9   : > { %v1385_v51 = vadd.f32 %v1374_v50, %v1360_v32 }
 0x7fb   : > { %v1401_v11 = vmul.f32 0.2, %v1385_v51  ;;  %vm1393_vm8 = vcmp.gt.f32.partialorder %v1385_v51, 0.0 }
 0x7fd   : > { %v1409_v16 = vsel %vm1393_vm8, %v1385_v51, %v1401_v11 }
 0x808   : > { %v3518_v25 = vpop.permute.xlu0 %1326 }
 0x810   : > { %v1366_v28 = vpop.permute.xlu0 %1365 }
 0x811   : > { %v1386_v14 = vadd.f32 %v1374_v50, %v1366_v28  ;;  %v1380_v28 = vadd.f32 %v1371_v30, %v3518_v25 }
 0x813   : > { %v1402_v32 = vmul.f32 0.2, %v1386_v14  ;;  %vm1394_vm13 = vcmp.gt.f32.partialorder %v1386_v14, 0.0  ;;  %v1396_v37 = vmul.f32 0.2, %v1380_v28  ;;  %vm1388_vm14 = vcmp.gt.f32.partialorder %v1380_v28, 0.0 }
 0x815   : > { %v1410_v34 = vsel %vm1394_vm13, %v1386_v14, %v1402_v32 }
 0x864   : > { %v1100_v41 = vpop.trf.xlu0 }
 0x865   : > { %v1116_v46 = vperm.slane %v1100_v41, 0  ;;  %v1404_v41 = vsel %vm1388_vm14, %v1380_v28, %v1396_v37 }
 0x867   : > { %v1117_v56 = vmul.f32 %v1116_v46, %v1082_v43  ;;  %v1118_v58 = vmul.f32 %v1116_v46, %v1083_v45 }
 0x869   : > { %v3544_v61 = vmax.f32 %v1117_v56, %v1119_v52  ;;  %v3546_v63 = vmax.f32 %v1118_v58, %v1120_v55 }
 0x86b   : > { %vm1411_vm5 = vcmp.gt.f32.partialorder %v3544_v61, 0.0  ;;  %vm1412_vm7 = vcmp.gt.f32.partialorder %v3546_v63, 0.0 }
 0x86c   : > { %v1421_v2 = vsel %vm1411_vm5, %v1407_v0, -1e+09  ;;  %v1419_v3 = vsel %vm1411_vm5, %v1405_v62, -1e+09  ;;  %v1417_v4 = vsel %vm1411_vm5, %v1403_v1, -1e+09 }
 0x86d   : > { %v1437_v6 = vsel %vm769_vm3, %v1421_v2, -inf  ;;  %v1431_v7 = vsel %vm769_vm3, %v1419_v3, -inf  ;;  %v1425_v8 = vsel %vm769_vm3, %v1417_v4, -inf  ;;  %v1420_v15 = vsel %vm1412_vm7, %v1406_v13, -1e+09 }
 0x86e   : > { %1438 = vmax.xlane.f32.xlu0 %v1437_v6  ;;  %1432 = vmax.xlane.f32.xlu1 %v1431_v7  ;;  %v1423_v18 = vsel %vm1411_vm5, %v1409_v16, -1e+09  ;;  %v1434_v23 = vsel %vm769_vm3, %v1420_v15, -inf  ;;  %v1422_v31 = vsel %vm1412_vm7, %v1408_v29, -1e+09 }
 0x86f   : > { %1426 = vmax.xlane.f32.xlu2 %v1425_v8  ;;  %v1443_v27 = vsel %vm769_vm3, %v1423_v18, -inf  ;;  %v1424_v35 = vsel %vm1412_vm7, %v1410_v34, -1e+09  ;;  %v1440_v38 = vsel %vm769_vm3, %v1422_v31, -inf  ;;  %v1418_v17 = vsel %vm1412_vm7, %v1404_v41, -1e+09 }
 0x870   : > { %v1446_v39 = vsel %vm769_vm3, %v1424_v35, -inf  ;;  %v1428_v25 = vsel %vm769_vm3, %v1418_v17, -inf }
 0x876   : > { %1435 = vmax.xlane.f32.xlu1 %v1434_v23 }
 0x877   : > { %1444 = vmax.xlane.f32.xlu2 %v1443_v27 }
 0x87e   : > { %1441 = vmax.xlane.f32.xlu1 %v1440_v38 }
 0x87f   : > { %1447 = vmax.xlane.f32.xlu2 %v1446_v39 }
 0x886   : > { %1429 = vmax.xlane.f32.xlu1 %v1428_v25 }
 0x8e1   : > { %v1439_v30 = vpop.xlane.xlu0 %1438  ;;  %v1433_v43 = vpop.xlane.xlu1 %1432 }
 0x8e2   : > { %v1453_v45 = vsub.f32 %v1421_v2, %v1439_v30  ;;  %v1451_v46 = vsub.f32 %v1419_v3, %v1433_v43  ;;  %v1427_v47 = vpop.xlane.xlu2 %1426 }
 0x8e3   : > { %v1449_v52 = vsub.f32 %v1417_v4, %v1427_v47 }
 0x8e4   : > { %v1465_v49 = vmul.f32 1.442695, %v1453_v45  ;;  %v1461_v50 = vmul.f32 1.442695, %v1451_v46 }
 0x8e5   : > { %v1457_v53 = vmul.f32 1.442695, %v1449_v52 }
 0x8e6   : > { %2983 = vpow2.f32 %v1465_v49 }
 0x8e7   : > { %2985 = vpow2.f32 %v1461_v50 }
 0x8e8   : > { %2987 = vpow2.f32 %v1457_v53 }
 0x8e9   : > { %v1436_v54 = vpop.xlane.xlu1 %1435 }
 0x8ea   : > { %v1452_v56 = vsub.f32 %v1420_v15, %v1436_v54  ;;  %v1445_v58 = vpop.xlane.xlu2 %1444 }
 0x8eb   : > { %v1455_v51 = vsub.f32 %v1423_v18, %v1445_v58 }
 0x8ec   : > { %v2984_v60 = vpop.eup %2983  ;;  %v1463_v55 = vmul.f32 1.442695, %v1452_v56 }
 0x8ed   : > { %v2986_v62 = vpop.eup %2985  ;;  %v1485_v0 = vsel %vm769_vm3, %v2984_v60, 0.0  ;;  %v1469_v2 = vmul.f32 1.442695, %v1455_v51 }
 0x8ee   : > { %2989 = vpow2.f32 %v1463_v55  ;;  %v1479_v1 = vsel %vm769_vm3, %v2986_v62, 0.0  ;;  %1486 = vadd.xlane.f32.xlu2 %v1485_v0  ;;  %v2988_v6 = vpop.eup %2987 }
 0x8ef   : > { %1480 = vadd.xlane.f32.xlu1 %v1479_v1  ;;  %2991 = vpow2.f32 %v1469_v2  ;;  %v1473_v12 = vsel %vm769_vm3, %v2988_v6, 0.0 }
 0x8f1   : > { %v1442_v3 = vpop.xlane.xlu1 %1441 }
 0x8f2   : > { %v1454_v4 = vsub.f32 %v1422_v31, %v1442_v3  ;;  %v1448_v5 = vpop.xlane.xlu2 %1447 }
 0x8f3   : > { %v1456_v9 = vsub.f32 %v1424_v35, %v1448_v5 }
 0x8f4   : > { %v2990_v7 = vpop.eup %2989  ;;  %v1467_v8 = vmul.f32 1.442695, %v1454_v4 }
 0x8f5   : > { %v1482_v11 = vsel %vm769_vm3, %v2990_v7, 0.0  ;;  %v1471_v13 = vmul.f32 1.442695, %v1456_v9  ;;  %v2992_v15 = vpop.eup %2991 }
 0x8f6   : > { %2993 = vpow2.f32 %v1467_v8  ;;  %1483 = vadd.xlane.f32.xlu2 %v1482_v11  ;;  %v1491_v32 = vsel %vm769_vm3, %v2992_v15, 0.0 }
 0x8f7   : > { %1474 = vadd.xlane.f32.xlu1 %v1473_v12  ;;  %2995 = vpow2.f32 %v1471_v13 }
 0x8f9   : > { %v1430_v14 = vpop.xlane.xlu1 %1429 }
 0x8fa   : > { %v1450_v16 = vsub.f32 %v1418_v17, %v1430_v14 }
 0x8fc   : > { %v2994_v18 = vpop.eup %2993  ;;  %v1459_v10 = vmul.f32 1.442695, %v1450_v16 }
 0x8fd   : > { %v1488_v23 = vsel %vm769_vm3, %v2994_v18, 0.0  ;;  %v2996_v27 = vpop.eup %2995 }
 0x8fe   : > { %2997 = vpow2.f32 %v1459_v10  ;;  %1492 = vadd.xlane.f32.xlu2 %v1491_v32  ;;  %v1494_v31 = vsel %vm769_vm3, %v2996_v27, 0.0 }
 0x8ff   : > { %1489 = vadd.xlane.f32.xlu1 %v1488_v23 }
 0x904   : > { %v2998_v28 = vpop.eup %2997 }
 0x905   : > { %v1476_v29 = vsel %vm769_vm3, %v2998_v28, 0.0 }
 0x906   : > { %1495 = vadd.xlane.f32.xlu2 %v1494_v31 }
 0x907   : > { %1477 = vadd.xlane.f32.xlu1 %v1476_v29 }
 0x961   : > { %v1487_v34 = vpop.xlane.xlu2 %1486 }
 0x962   : > { %v1481_v35 = vpop.xlane.xlu1 %1480  ;;  %2999 = vrcp.f32 %v1487_v34 }
 0x963   : > { %3001 = vrcp.f32 %v1481_v35  ;;  %v2850_v35 = vld [vmem:[%s3939_s2 + $0x58] sm:$0xff] }
 0x964   : > { %1819 = vmatpush.msrb.mxu1 %v2850_v35 }
 0x968   : > { %v3000_v37 = vpop.eup %2999 }
 0x969   : > { %v3002_v38 = vpop.eup %3001  ;;  %v1509_v39 = vmul.f32 %v3000_v37, %v2984_v60  ;;  %v1484_v41 = vpop.xlane.xlu2 %1483  ;;  %v2849_v37 = vld [vmem:[%s3939_s2 + $0x50] sm:$0xff] }
 0x96a   : > { %v1507_v17 = vmul.f32 %v3002_v38, %v2986_v62  ;;  %v1475_v25 = vpop.xlane.xlu1 %1474  ;;  %3003 = vrcp.f32 %v1484_v41  ;;  %1820 = vmatpush.msrb.mxu1 %v2849_v37 }
 0x96b   : > { %3005 = vrcp.f32 %v1475_v25  ;;  %2838 = vmatmul.msk.f32.vlgmr.msrb.gmra.mxu3 %vm769_vm3, %v1509_v39 }
 0x96c   : > { %2836 = vmatmul.msk.f32.vlgmr.msra.gmra.mxu2 %vm769_vm3, %v1507_v17  ;;  %1821 = vmatpush.msrb.mxu1 %v2848_v48 }
 0x970   : > { %v3004_v30 = vpop.eup %3003 }
 0x971   : > { %v3006_v43 = vpop.eup %3005  ;;  %v1493_v45 = vpop.xlane.xlu2 %1492  ;;  %v1508_v46 = vmul.f32 %v3004_v30, %v2990_v7  ;;  %v2944_v7 = vld [vmem:[%s3942_s5 + $0x1] ss:$0 sm:$0xff] }
 0x972   : > { %v1505_v47 = vmul.f32 %v3006_v43, %v2988_v6  ;;  %v1490_v49 = vpop.xlane.xlu1 %1489  ;;  %3007 = vrcp.f32 %v1493_v45  ;;  %v2847_v30 = vld [vmem:[%s3939_s2 + $0x40] sm:$0xff]  ;;  %v2862_v43 = vld [vmem:[%s3941_s4 + $0x58] sm:$0xff]  ;;  %v2861_v45 = vld [vmem:[%s3941_s4 + $0x50] sm:$0xff] }
 0x973   : > { %3009 = vrcp.f32 %v1490_v49  ;;  %1822 = vmatpush.msrb.mxu1 %v2847_v30  ;;  %1881 = vmatpush.msra.mxu3 %v2862_v43  ;;  %v2860_v49 = vld [vmem:[%s3941_s4 + $0x48] sm:$0xff] }
 0x974   : > { %2834 = vmatmul.msk.f32.vlgmr.msra.gmra.mxu1 %vm769_vm3, %v1505_v47  ;;  %2837 = vmatmul.msk.f32.gmra.mxu2 %vm769_vm3, %v1508_v46  ;;  %v2856_v46 = vld [vmem:[%s3940_s3 + $0x58] sm:$0xff]  ;;  %v2855_v47 = vld [vmem:[%s3940_s3 + $0x50] sm:$0xff] }
 0x975   : > { %1853 = vmatpush.msrb.mxu2 %v2856_v46  ;;  %1882 = vmatpush.msra.mxu3 %v2861_v45 }
 0x977   : > { %1854 = vmatpush.msrb.mxu2 %v2855_v47  ;;  %1883 = vmatpush.msra.mxu3 %v2860_v49 }
 0x978   : > { %v3008_v50 = vpop.eup %3007 }
 0x979   : > { %v3010_v52 = vpop.eup %3009  ;;  %v1511_v53 = vmul.f32 %v3008_v50, %v2992_v15  ;;  %v1496_v54 = vpop.xlane.xlu2 %1495  ;;  %v2854_v50 = vld [vmem:[%s3940_s3 + $0x48] sm:$0xff] }
 0x97a   : > { %v1478_v56 = vpop.xlane.xlu1 %1477  ;;  %3011 = vrcp.f32 %v1496_v54  ;;  %v1510_v58 = vmul.f32 %v3010_v52, %v2994_v18  ;;  %v2859_v52 = vld [vmem:[%s3941_s4 + $0x40] sm:$0xff]  ;;  %1855 = vmatpush.msrb.mxu2 %v2854_v50 }
 0x97b   : > { %3013 = vrcp.f32 %v1478_v56  ;;  %2840 = vmatmul.msk.f32.vlgmr.msrb.gmra.mxu0 %vm769_vm3, %v1511_v53  ;;  %1884 = vmatpush.msra.mxu3 %v2859_v52 }
 0x97c   : > { %2839 = vmatmul.msk.f32.gmra.mxu3 %vm769_vm3, %v1510_v58 }
 0x980   : > { %v3012_v60 = vpop.eup %3011 }
 0x981   : > { %v3014_v55 = vpop.eup %3013  ;;  %v1512_v51 = vmul.f32 %v3012_v60, %v2996_v27 }
 0x982   : > { %v1506_v62 = vmul.f32 %v3014_v55, %v2998_v28 }
 0x983   : > { %2841 = vmatmul.msk.f32.gmra.mxu0 %vm769_vm3, %v1512_v51 }
 0x984   : > { %2835 = vmatmul.msk.f32.gmra.mxu1 %vm769_vm3, %v1506_v62 }
 0x9ee   : > { %v1602_v3 = vpop.f32.mrf.mxu3 }
 0x9ef   : > { %v1573_v1 = vpop.f32.mrf.mxu2 }
 0x9f1   : > { %v1544_v0 = vpop.f32.mrf.mxu1 }
 0x9f2   : > { %v1637_v2 = vadd.f32 %v1573_v1, %v1544_v0 }
 0x9f4   : > { %v1639_v4 = vadd.f32 %v1637_v2, %v1602_v3 }
 0x9f7   : > { %v1576_v12 = vpop.f32.mrf.mxu2 }
 0x9f8   : > { %v1631_v5 = vpop.f32.mrf.mxu0 }
 0x9f9   : > { %v3593_v6 = vadd.f32 %v1639_v4, %v1631_v5 }
 0x9fb   : > { %v1643_v8 = vmax.f32 %v3593_v6, 0.0 }
 0x9fd   : > { %v1650_v9 = vmul.f32 %v2944_v7, %v1643_v8 }
 0x9ff   : > { %v1652_v11 = vsel %vm505_vm0, %v1650_v9, 0.0  ;;  %v1605_v15 = vpop.f32.mrf.mxu3 }
 0xa00   : > { %1653 = vadd.xlane.f32.xlu1 %v1652_v11  ;;  %v1634_v18 = vpop.f32.mrf.mxu0  ;;  %v2853_v11 = vld [vmem:[%s3940_s3 + $0x40] sm:$0xff] }
 0xa01   : > { %v1547_v13 = vpop.f32.mrf.mxu1  ;;  %1856 = vmatpush.msrb.mxu2 %v2853_v11 }
 0xa02   : > { %v1638_v14 = vadd.f32 %v1576_v12, %v1547_v13 }
 0xa04   : > { %v1640_v16 = vadd.f32 %v1638_v14, %v1605_v15 }
 0xa06   : > { %v3602_v10 = vadd.f32 %v1640_v16, %v1634_v18 }
 0xa08   : > { %v1644_v23 = vmax.f32 %v3602_v10, 0.0 }
 0xa0a   : > { %v1651_v32 = vmul.f32 %v2944_v7, %v1644_v23 }
 0xa0c   : > { %v1655_v27 = vsel %vm505_vm0, %v1651_v32, 0.0 }
 0xa0d   : > { %1656 = vadd.xlane.f32.xlu2 %v1655_v27 }
 0xa73   : > { %v1654_v28 = vpop.xlane.xlu1 %1653 }
 0xa74   : > { %v1658_v29 = vsel %vm1133_vm11, %v1654_v28, -1e+30  ;;  %3015 = vtanh.f32 %v1654_v28 }
 0xa75   : > { %1660 = vxpose.xlu1.b32.start [1/2] (short) (narrow) %v1658_v29, 8 }
 0xa7a   : > { %v3016_v53 = vpop.eup %3015 }
 0xa7b   : > { %v1719_v56 = vmul.f32 %v3016_v53, %v1643_v8 }
 0xa80   : > { %v1657_v31 = vpop.xlane.xlu2 %1656 }
 0xa81   : > { %v1659_v34 = vsel %vm1134_vm10, %v1657_v31, -1e+30  ;;  %3017 = vtanh.f32 %v1657_v31 }
 0xa82   : > { %1661 = vxpose.xlu1.b32.end [2/2] (short) (narrow) %v1659_v34, 8 }
 0xa87   : > { %v3018_v55 = vpop.eup %3017 }
 0xa88   : > { %v1720_v62 = vmul.f32 %v3018_v55, %v1644_v23 }
 0xb1e   : > { %v1676_v38 = vpop.trf.xlu1 }
 0xb1f   : > { %v1692_v39 = vperm.slane %v1676_v38, 0 }
 0xb21   : > { %vm1693_vm11 = vcmp.gt.f32.partialorder %v1692_v39, %v1658_v29  ;;  %vm1695_vm10 = vcmp.eq.f32.partialorder %v1692_v39, %v1658_v29  ;;  %vm1696_vm15 = vcmp.eq.f32.partialorder %v1692_v39, %v1659_v34  ;;  %vm1694_vm5 = vcmp.gt.f32.partialorder %v1692_v39, %v1659_v34 }
 0xb22   : > { %vm1697_vm2 = vmand %vm1695_vm10, %vm1054_vm1 }
 0xb23   : > { %vm1699_vm4 = vmor %vm1693_vm11, %vm1697_vm2 }
 0xb24   : > { %v2843_v44 = vsel %vm1699_vm4, 1.0, %v3143_v24  ;;  %vm1698_vm6 = vmand %vm1696_vm15, %vm1055_vm12 }
 0xb25   : > { %v1705_v41 = vsel %vm769_vm3, %v2843_v44, 0.0  ;;  %vm1700_vm7 = vmor %vm1694_vm5, %vm1698_vm6 }
 0xb26   : > { %1706 = vadd.xlane.f32.xlu2 %v1705_v41  ;;  %v2844_v17 = vsel %vm1700_vm7, 1.0, %v3143_v24 }
 0xb27   : > { %v1708_v25 = vsel %vm769_vm3, %v2844_v17, 0.0 }
 0xb2e   : > { %1709 = vadd.xlane.f32.xlu2 %v1708_v25 }
 0xb99   : > { %v1707_v54 = vpop.xlane.xlu2 %1706 }
 0xb9a   : > { %vm1711_vm8 = vcmp.lt.f32.partialorder %v1707_v54, 4.0 }
 0xb9b   : > { %v3656_v58 = vsel %vm1711_vm8, 1.0, %v3143_v24 }
 0xb9c   : > { %v1721_v60 = vmul.f32 %v3656_v58, %v1719_v56  ;;  %vm1774_vm9 = vcmp.gt.f32.partialorder %v3656_v58, 0.0  ;;  %v1723_v56 = vmul.f32 %v3656_v58, %v3544_v61 }
 0xb9e   : > { %2851 = vmatmul.msk.f32.vlgmr.msrb.gmra.mxu1 %vm505_vm0, %v1721_v60  ;;  %v1780_v2 = vsel %vm1774_vm9, %v1721_v60, -1e+30  ;;  %v1764_v3 = vsel %vm505_vm0, %v1721_v60, 0.0 }
 0xb9f   : > { %v1782_v7 = vsel %vm505_vm0, %v1780_v2, -inf }
 0xba1   : > { %v1710_v51 = vpop.xlane.xlu2 %1709 }
 0xba2   : > { %vm1712_vm13 = vcmp.lt.f32.partialorder %v1710_v51, 4.0  ;;  %v1760_v51 = vmul.f32 %v3656_v58, %v3531_v40 }
 0xba3   : > { %v3662_v0 = vsel %vm1712_vm13, 1.0, %v3143_v24 }
 0xba4   : > { %v1722_v1 = vmul.f32 %v3662_v0, %v1720_v62  ;;  %vm1775_vm14 = vcmp.gt.f32.partialorder %v3662_v0, 0.0  ;;  %v1724_v55 = vmul.f32 %v3662_v0, %v3546_v63  ;;  %v1761_v61 = vmul.f32 %v3662_v0, %v3534_v42 }
 0xba6   : > { %v1765_v4 = vsel %vm505_vm0, %v1722_v1, 0.0  ;;  %2852 = vmatmul.msk.f32.gmra.mxu1 %vm505_vm0, %v1722_v1  ;;  %v1781_v5 = vsel %vm1775_vm14, %v1722_v1, -1e+30 }
 0xba7   : > { %v3673_v6 = vadd.f32 %v1765_v4, %v1764_v3  ;;  %v1783_v8 = vsel %vm505_vm0, %v1781_v5, -inf }
 0xba8   : > { %v3677_v9 = vmax.f32 %v1782_v7, %v1783_v8 }
 0xc1b   : > { %v1824_v12 = vpop.f32.mrf.mxu1 }
 0xc1c   : > { %2857 = vmatmul.msk.f32.vlgmr.msrb.gmra.mxu2 %vm505_vm0, %v1824_v12  ;;  %2863 = vmatmul.msk.f32.vlgmr.msra.gmra.mxu3 %vm505_vm0, %v1824_v12  ;;  %v2154_v10 = vmul.f32 %v1824_v12, %v3322_v19  ;;  %v2156_v23 = vmul.f32 %v1824_v12, %v3333_v26  ;;  %v2158_v32 = vmul.f32 %v1824_v12, %v3324_v20 }
 0xc1d   : > { %v2160_v27 = vmul.f32 %v1824_v12, %v3326_v21 }
 0xc23   : > { %v1827_v13 = vpop.f32.mrf.mxu1 }
 0xc24   : > { %2858 = vmatmul.msk.f32.gmra.mxu2 %vm505_vm0, %v1827_v13  ;;  %2864 = vmatmul.msk.f32.gmra.mxu3 %vm505_vm0, %v1827_v13  ;;  %v2155_v14 = vmul.f32 %v1827_v13, %v3322_v19  ;;  %v2157_v15 = vmul.f32 %v1827_v13, %v3333_v26  ;;  %v2159_v16 = vmul.f32 %v1827_v13, %v3324_v20 }
 0xc25   : > { %v2161_v18 = vmul.f32 %v1827_v13, %v3326_v21 }
 0xc26   : > { %2182 = vmatpush.msra.mxu0 %v2155_v14  ;;  %2211 = vmatpush.msra.mxu1 %v2157_v15 }
 0xc27   : > { %2240 = vmatpush.msra.mxu2 %v2159_v16  ;;  %2269 = vmatpush.msrb.mxu3 %v2161_v18 }
 0xc28   : > { %2183 = vmatpush.msra.mxu0 %v2154_v10  ;;  %2212 = vmatpush.msra.mxu1 %v2156_v23 }
 0xc29   : > { %2241 = vmatpush.msra.mxu2 %v2158_v32  ;;  %2270 = vmatpush.msrb.mxu3 %v2160_v27 }
 0xc9f   : > { %v1858_v28 = vpop.f32.mrf.mxu2  ;;  %v1886_v29 = vpop.f32.mrf.mxu3 }
 0xca0   : > { %1924 = vxpose.xlu0.b32.start [1/2] (short) (narrow) %v1886_v29, 8  ;;  %1892 = vxpose.xlu2.b32.start [1/2] (short) (narrow) %v1858_v28, 8 }
 0xca7   : > { %v1861_v31 = vpop.f32.mrf.mxu2  ;;  %v1889_v34 = vpop.f32.mrf.mxu3 }
 0xca8   : > { %1925 = vxpose.xlu0.b32.end [2/2] (short) (narrow) %v1889_v34, 8  ;;  %1893 = vxpose.xlu2.b32.end [2/2] (short) (narrow) %v1861_v31, 8 }
 0xd0a   : > { %2941 = vset.pattern.permute.xlu2 %v3341_v33 }
 0xd39   : > { %v3698_v37 = vpop.trf.xlu2 }
 0xd3a   : > { %v2010_v17 = vrot.slane %v3698_v37, 2  ;;  %v2011_v25 = vrot.slane %v3698_v37, 3  ;;  %v2012_v46 = vperm.slane %v3698_v37, 0  ;;  %v2009_v47 = vrot.slane %v3698_v37, 1 }
 0xd3c   : > { %v2014_v43 = vperm.slane %v2010_v17, 0  ;;  %v2015_v45 = vperm.slane %v2011_v25, 0  ;;  %v2013_v54 = vperm.slane %v2009_v47, 0 }
 0xd44   : > { %v1940_v19 = vpop.trf.xlu0 }
 0xd45   : > { %v1995_v26 = vperm.slane %v1940_v19, 3  ;;  %v1982_v35 = vperm.slane %v1940_v19, 2  ;;  %v1956_v20 = vperm.slane %v1940_v19, 0  ;;  %v1969_v21 = vperm.slane %v1940_v19, 1 }
 0xd47   : > { %2006 = vperm.xlu1 %2937, %v1995_v26   ;;  %1993 = vperm.xlu0 %2940, %v1982_v35  }
 0xd48   : > { %1987 = vperm.xlu2 %2941, %v1982_v35  }
 0xd50   : > { %2000 = vperm.xlu2 %2941, %v1995_v26  }
 0xd58   : > { %1961 = vperm.xlu2 %2941, %v1956_v20  }
 0xd60   : > { %1974 = vperm.xlu2 %2941, %v1969_v21  }
 0xd68   : > { %2942 = vset.pattern.permute.xlu2 %v3346_v36  ;;  %v1785_v36 = vrot.slane %v3677_v9, 4 }
 0xd70   : > { %1967 = vperm.xlu2 %2942, %v1956_v20  }
 0xd78   : > { %1980 = vperm.xlu2 %2942, %v1969_v21  }
 0xd9e   : > { %1725 = vxpose.xlu2.b32.start [1/2] (short) (narrow) %v3656_v58, 8 }
 0xda2   : > { %v1988_v48 = vpop.permute.xlu2 %1987 }
 0xda3   : > { %v2024_v49 = vadd.f32 %v2014_v43, %v1988_v48 }
 0xda5   : > { %v2040_v62 = vmul.f32 0.2, %v2024_v49  ;;  %vm2032_vm10 = vcmp.gt.f32.partialorder %v2024_v49, 0.0 }
 0xda6   : > { %1726 = vxpose.xlu2.b32.end [2/2] (short) (narrow) %v3662_v0, 8 }
 0xda7   : > { %v2048_v12 = vsel %vm2032_vm10, %v2024_v49, %v2040_v62 }
 0xdaa   : > { %v2001_v38 = vpop.permute.xlu2 %2000 }
 0xdab   : > { %v2026_v50 = vadd.f32 %v2015_v45, %v2001_v38 }
 0xdad   : > { %v2042_v1 = vmul.f32 0.2, %v2026_v50  ;;  %vm2034_vm11 = vcmp.gt.f32.partialorder %v2026_v50, 0.0 }
 0xdaf   : > { %v2050_v40 = vsel %vm2034_vm11, %v2026_v50, %v2042_v1 }
 0xdb2   : > { %v1962_v39 = vpop.permute.xlu2 %1961 }
 0xdb3   : > { %v2020_v52 = vadd.f32 %v2012_v46, %v1962_v39 }
 0xdb5   : > { %v2036_v2 = vmul.f32 0.2, %v2020_v52  ;;  %vm2028_vm15 = vcmp.gt.f32.partialorder %v2020_v52, 0.0 }
 0xdb7   : > { %v2044_v13 = vsel %vm2028_vm15, %v2020_v52, %v2036_v2 }
 0xdb9   : > { %v2007_v3 = vpop.permute.xlu1 %2006  ;;  %v1994_v28 = vpop.permute.xlu0 %1993 }
 0xdba   : > { %v1975_v44 = vpop.permute.xlu2 %1974  ;;  %v2027_v11 = vadd.f32 %v2015_v45, %v2007_v3  ;;  %v2025_v31 = vadd.f32 %v2014_v43, %v1994_v28 }
 0xdbb   : > { %v2022_v7 = vadd.f32 %v2013_v54, %v1975_v44 }
 0xdbc   : > { %v2043_v27 = vmul.f32 0.2, %v2027_v11  ;;  %vm2035_vm5 = vcmp.gt.f32.partialorder %v2027_v11, 0.0  ;;  %v2041_v21 = vmul.f32 0.2, %v2025_v31  ;;  %vm2033_vm7 = vcmp.gt.f32.partialorder %v2025_v31, 0.0 }
 0xdbd   : > { %v2038_v10 = vmul.f32 0.2, %v2022_v7  ;;  %vm2030_vm4 = vcmp.gt.f32.partialorder %v2022_v7, 0.0 }
 0xdbe   : > { %v2051_v35 = vsel %vm2035_vm5, %v2027_v11, %v2043_v27  ;;  %v2049_v44 = vsel %vm2033_vm7, %v2025_v31, %v2041_v21  ;;  %vm2402_vm7 = vcmask 1040384  }
 0xdbf   : > { %v2046_v34 = vsel %vm2030_vm4, %v2022_v7, %v2038_v10 }
 0xdca   : > { %v3700_v41 = vpop.permute.xlu2 %1967 }
 0xdcb   : > { %v2021_v39 = vadd.f32 %v2012_v46, %v3700_v41 }
 0xdcd   : > { %v2037_v43 = vmul.f32 0.2, %v2021_v39  ;;  %vm2029_vm13 = vcmp.gt.f32.partialorder %v2021_v39, 0.0 }
 0xdcf   : > { %v2045_v49 = vsel %vm2029_vm13, %v2021_v39, %v2037_v43  ;;  %vm2418_vm13 = vcmask 523264  }
 0xdd2   : > { %v1981_v30 = vpop.permute.xlu2 %1980 }
 0xdd3   : > { %v2023_v19 = vadd.f32 %v2013_v54, %v1981_v30 }
 0xdd5   : > { %v2039_v48 = vmul.f32 0.2, %v2023_v19  ;;  %vm2031_vm8 = vcmp.gt.f32.partialorder %v2023_v19, 0.0 }
 0xdd7   : > { %v2047_v25 = vsel %vm2031_vm8, %v2023_v19, %v2039_v48  ;;  %vm2404_vm8 = vcmask 1041408  }
 0xe37   : > { %v1741_v53 = vpop.trf.xlu2 }
 0xe38   : > { %v1757_v60 = vperm.slane %v1741_v53, 0 }
 0xe3a   : > { %v1758_v4 = vmul.f32 %v1757_v60, %v1723_v56  ;;  %v1759_v5 = vmul.f32 %v1757_v60, %v1724_v55 }
 0xe3c   : > { %v1762_v8 = vmax.f32 %v1758_v4, %v1760_v51  ;;  %v1763_v14 = vmax.f32 %v1759_v5, %v1761_v61 }
 0xe3e   : > { %vm3714_vm2 = vcmp.gt.f32.partialorder %v1762_v8, 0.0  ;;  %vm3727_vm6 = vcmp.gt.f32.partialorder %v1763_v14, 0.0 }
 0xe3f   : > { %v2064_v15 = vsel %vm3714_vm2, %v2050_v40, -1e+09  ;;  %v2062_v16 = vsel %vm3714_vm2, %v2048_v12, -1e+09  ;;  %v2058_v18 = vsel %vm3714_vm2, %v2044_v13, -1e+09 }
 0xe40   : > { %v2084_v42 = vsel %vm769_vm3, %v2064_v15, -inf  ;;  %v2078_v23 = vsel %vm769_vm3, %v2062_v16, -inf  ;;  %v2066_v32 = vsel %vm769_vm3, %v2058_v18, -inf  ;;  %v2060_v26 = vsel %vm3714_vm2, %v2046_v34, -1e+09 }
 0xe41   : > { %2085 = vmax.xlane.f32.xlu1 %v2084_v42  ;;  %2079 = vmax.xlane.f32.xlu2 %v2078_v23  ;;  %v2065_v20 = vsel %vm3727_vm6, %v2051_v35, -1e+09  ;;  %v2072_v37 = vsel %vm769_vm3, %v2060_v26, -inf  ;;  %v2063_v17 = vsel %vm3727_vm6, %v2049_v44, -1e+09 }
 0xe42   : > { %2067 = vmax.xlane.f32.xlu0 %v2066_v32  ;;  %v2087_v38 = vsel %vm769_vm3, %v2065_v20, -inf  ;;  %v2061_v30 = vsel %vm3727_vm6, %v2047_v25, -1e+09  ;;  %v2081_v45 = vsel %vm769_vm3, %v2063_v17, -inf  ;;  %v2059_v41 = vsel %vm3727_vm6, %v2045_v49, -1e+09 }
 0xe43   : > { %v2075_v47 = vsel %vm769_vm3, %v2061_v30, -inf  ;;  %v2069_v46 = vsel %vm769_vm3, %v2059_v41, -inf }
 0xe49   : > { %2073 = vmax.xlane.f32.xlu1 %v2072_v37 }
 0xe4a   : > { %2088 = vmax.xlane.f32.xlu0 %v2087_v38 }
 0xe51   : > { %2082 = vmax.xlane.f32.xlu1 %v2081_v45 }
 0xe52   : > { %2076 = vmax.xlane.f32.xlu0 %v2075_v47 }
 0xe59   : > { %2070 = vmax.xlane.f32.xlu1 %v2069_v46 }
 0xeb4   : > { %v2086_v50 = vpop.xlane.xlu1 %2085  ;;  %v2080_v52 = vpop.xlane.xlu2 %2079 }
 0xeb5   : > { %v2096_v53 = vsub.f32 %v2064_v15, %v2086_v50  ;;  %v2094_v54 = vsub.f32 %v2062_v16, %v2080_v52  ;;  %v2068_v56 = vpop.xlane.xlu0 %2067 }
 0xeb6   : > { %v2090_v51 = vsub.f32 %v2058_v18, %v2068_v56 }
 0xeb7   : > { %v2110_v60 = vmul.f32 1.442695, %v2096_v53  ;;  %v2106_v55 = vmul.f32 1.442695, %v2094_v54 }
 0xeb8   : > { %v2098_v62 = vmul.f32 1.442695, %v2090_v51 }
 0xeb9   : > { %3019 = vpow2.f32 %v2110_v60 }
 0xeba   : > { %3021 = vpow2.f32 %v2106_v55 }
 0xebb   : > { %3023 = vpow2.f32 %v2098_v62 }
 0xebc   : > { %v2074_v1 = vpop.xlane.xlu1 %2073 }
 0xebd   : > { %v2092_v2 = vsub.f32 %v2060_v26, %v2074_v1  ;;  %v2089_v3 = vpop.xlane.xlu0 %2088 }
 0xebe   : > { %v2097_v7 = vsub.f32 %v2065_v20, %v2089_v3 }
 0xebf   : > { %v3020_v4 = vpop.eup %3019  ;;  %v2102_v5 = vmul.f32 1.442695, %v2092_v2 }
 0xec0   : > { %v3022_v8 = vpop.eup %3021  ;;  %v2132_v11 = vsel %vm769_vm3, %v3020_v4, 0.0  ;;  %v2112_v63 = vmul.f32 1.442695, %v2097_v7 }
 0xec1   : > { %3025 = vpow2.f32 %v2102_v5  ;;  %v2126_v61 = vsel %vm769_vm3, %v3022_v8, 0.0  ;;  %2133 = vadd.xlane.f32.xlu0 %v2132_v11  ;;  %v3024_v14 = vpop.eup %3023 }
 0xec2   : > { %2127 = vadd.xlane.f32.xlu1 %v2126_v61  ;;  %3027 = vpow2.f32 %v2112_v63  ;;  %v2114_v42 = vsel %vm769_vm3, %v3024_v14, 0.0  ;;  %v2945_v61 = vld [vmem:[%s3942_s5 + $0x2] ss:$0 sm:$0xff] }
 0xec4   : > { %v2083_v40 = vpop.xlane.xlu1 %2082 }
 0xec5   : > { %v2095_v12 = vsub.f32 %v2063_v17, %v2083_v40  ;;  %v2077_v13 = vpop.xlane.xlu0 %2076 }
 0xec6   : > { %v2093_v18 = vsub.f32 %v2061_v30, %v2077_v13 }
 0xec7   : > { %v3026_v15 = vpop.eup %3025  ;;  %v2108_v16 = vmul.f32 1.442695, %v2095_v12 }
 0xec8   : > { %v2120_v10 = vsel %vm769_vm3, %v3026_v15, 0.0  ;;  %v2104_v23 = vmul.f32 1.442695, %v2093_v18  ;;  %v3028_v27 = vpop.eup %3027 }
 0xec9   : > { %3029 = vpow2.f32 %v2108_v16  ;;  %2121 = vadd.xlane.f32.xlu0 %v2120_v10  ;;  %v2135_v19 = vsel %vm769_vm3, %v3028_v27, 0.0 }
 0xeca   : > { %2115 = vadd.xlane.f32.xlu1 %v2114_v42  ;;  %3031 = vpow2.f32 %v2104_v23 }
 0xecc   : > { %v2071_v32 = vpop.xlane.xlu1 %2070 }
 0xecd   : > { %v2091_v28 = vsub.f32 %v2059_v41, %v2071_v32 }
 0xecf   : > { %v3030_v29 = vpop.eup %3029  ;;  %v2100_v31 = vmul.f32 1.442695, %v2091_v28 }
 0xed0   : > { %v2129_v34 = vsel %vm769_vm3, %v3030_v29, 0.0  ;;  %v3032_v26 = vpop.eup %3031 }
 0xed1   : > { %3033 = vpow2.f32 %v2100_v31  ;;  %2136 = vadd.xlane.f32.xlu0 %v2135_v19  ;;  %v2123_v21 = vsel %vm769_vm3, %v3032_v26, 0.0 }
 0xed2   : > { %2130 = vadd.xlane.f32.xlu1 %v2129_v34 }
 0xed7   : > { %v3034_v35 = vpop.eup %3033 }
 0xed8   : > { %v2117_v20 = vsel %vm769_vm3, %v3034_v35, 0.0 }
 0xed9   : > { %2124 = vadd.xlane.f32.xlu0 %v2123_v21  ;;  %v1786_v21 = vmax.f32 %v3677_v9, %v1785_v36 }
 0xeda   : > { %2118 = vadd.xlane.f32.xlu1 %v2117_v20 }
 0xf34   : > { %v2134_v37 = vpop.xlane.xlu0 %2133 }
 0xf35   : > { %v2128_v48 = vpop.xlane.xlu1 %2127  ;;  %3035 = vrcp.f32 %v2134_v37  ;;  %v1144_v37 = vrot.slane %v3493_v59, 4 }
 0xf36   : > { %3037 = vrcp.f32 %v2128_v48  ;;  %v1787_v48 = vrot.slane %v1786_v21, 2 }
 0xf38   : > { %v1788_v33 = vmax.f32 %v1786_v21, %v1787_v48  ;;  %v2406_v48 = vld [vmem:[%s3944_s7] sm:$0xff] }
 0xf3a   : > { %v1789_v22 = vrot.slane %v1788_v33, 1 }
 0xf3b   : > { %v3036_v38 = vpop.eup %3035 }
 0xf3c   : > { %v3038_v39 = vpop.eup %3037  ;;  %v2152_v44 = vmul.f32 %v3036_v38, %v3020_v4  ;;  %v2122_v17 = vpop.xlane.xlu0 %2121  ;;  %v1145_v38 = vmax.f32 %v3493_v59, %v1144_v37  ;;  %v2407_v37 = vld [vmem:[%s3944_s7 + $0x8] sm:$0xff] }
 0xf3d   : > { %v2150_v25 = vmul.f32 %v3038_v39, %v3022_v8  ;;  %v2116_v30 = vpop.xlane.xlu1 %2115  ;;  %3039 = vrcp.f32 %v2122_v17 }
 0xf3e   : > { %3041 = vrcp.f32 %v2116_v30  ;;  %2871 = vmatmul.msk.f32.vlgmr.msrb.gmra.mxu3 %vm769_vm3, %v2152_v44  ;;  %v1146_v39 = vrot.slane %v1145_v38, 2  ;;  %v1790_v44 = vmax.f32 %v1788_v33, %v1789_v22 }
 0xf3f   : > { %2869 = vmatmul.msk.f32.vlgmr.msra.gmra.mxu2 %vm769_vm3, %v2150_v25 }
 0xf40   : > { %v1147_v17 = vmax.f32 %v1145_v38, %v1146_v39  ;;  %v2442_v38 = vld [vmem:[%s3945_s8] sm:$0xff] }
 0xf42   : > { %v1148_v25 = vrot.slane %v1147_v17, 1 }
 0xf43   : > { %v3040_v43 = vpop.eup %3039 }
 0xf44   : > { %v3042_v45 = vpop.eup %3041  ;;  %v2148_v47 = vmul.f32 %v3040_v43, %v3026_v15  ;;  %v2137_v49 = vpop.xlane.xlu0 %2136  ;;  %v1149_v30 = vmax.f32 %v1147_v17, %v1148_v25 }
 0xf45   : > { %v2146_v41 = vmul.f32 %v3042_v45, %v3024_v14  ;;  %v2131_v46 = vpop.xlane.xlu1 %2130  ;;  %3043 = vrcp.f32 %v2137_v49 }
 0xf46   : > { %3045 = vrcp.f32 %v2131_v46  ;;  %2867 = vmatmul.msk.f32.vlgmr.msra.gmra.mxu1 %vm769_vm3, %v2148_v47 }
 0xf47   : > { %2865 = vmatmul.msk.f32.vlgmr.msra.gmra.mxu0 %vm769_vm3, %v2146_v41 }
 0xf4b   : > { %v3044_v50 = vpop.eup %3043 }
 0xf4c   : > { %v3046_v52 = vpop.eup %3045  ;;  %v2125_v53 = vpop.xlane.xlu0 %2124  ;;  %v2153_v54 = vmul.f32 %v3044_v50, %v3028_v27  ;;  %v1767_v50 = vrot.slane %v3673_v6, 4 }
 0xf4d   : > { %v2119_v56 = vpop.xlane.xlu1 %2118  ;;  %3047 = vrcp.f32 %v2125_v53  ;;  %v2151_v60 = vmul.f32 %v3046_v52, %v3030_v29  ;;  %v2413_v53 = vld [vmem:[%s3944_s7 + $0x38] sm:$0xff] }
 0xf4e   : > { %3049 = vrcp.f32 %v2119_v56  ;;  %2872 = vmatmul.msk.f32.gmra.mxu3 %vm769_vm3, %v2153_v54  ;;  %v2412_v54 = vld [vmem:[%s3944_s7 + $0x30] sm:$0xff]  ;;  %v3807_v56 = vld [vmem:[%s3945_s8 + $0x18] sm:$0xff]  ;;  %2430 = vmatpush.msrb.mxu0 %v2413_v53 }
 0xf4f   : > { %2870 = vmatmul.msk.f32.gmra.mxu2 %vm769_vm3, %v2151_v60  ;;  %2461 = vmatpush.msrb.mxu1 %v3807_v56 }
 0xf50   : > { %2524 = vmatpush.msrb.mxu2 %v3807_v56  ;;  %2431 = vmatpush.msrb.mxu0 %v2412_v54 }
 0xf53   : > { %v3048_v55 = vpop.eup %3047 }
 0xf54   : > { %v3050_v51 = vpop.eup %3049  ;;  %v2149_v62 = vmul.f32 %v3048_v55, %v3032_v26 }
 0xf55   : > { %v2147_v1 = vmul.f32 %v3050_v51, %v3034_v35 }
 0xf56   : > { %2868 = vmatmul.msk.f32.gmra.mxu1 %vm769_vm3, %v2149_v62 }
 0xf57   : > { %2866 = vmatmul.msk.f32.gmra.mxu0 %vm769_vm3, %v2147_v1  ;;  %v2411_v1 = vld [vmem:[%s3944_s7 + $0x28] sm:$0xff] }
 0xf58   : > { %2432 = vmatpush.msrb.mxu0 %v2411_v1 }
 0xfc1   : > { %v2272_v8 = vpop.f32.mrf.mxu3 }
 0xfc2   : > { %v2243_v5 = vpop.f32.mrf.mxu2 }
 0xfc3   : > { %v2214_v2 = vpop.f32.mrf.mxu1 }
 0xfc4   : > { %v2185_v3 = vpop.f32.mrf.mxu0 }
 0xfc5   : > { %v2278_v4 = vadd.f32 %v2214_v2, %v2185_v3  ;;  %v2444_v2 = vld [vmem:[%s3945_s8 + $0x10] sm:$0xff] }
 0xfc6   : > { %2462 = vmatpush.msrb.mxu1 %v2444_v2  ;;  %2525 = vmatpush.msrb.mxu2 %v2444_v2 }
 0xfc7   : > { %v2280_v7 = vadd.f32 %v2278_v4, %v2243_v5  ;;  %v2443_v5 = vld [vmem:[%s3945_s8 + $0x8] sm:$0xff] }
 0xfc8   : > { %2463 = vmatpush.msrb.mxu1 %v2443_v5  ;;  %2526 = vmatpush.msrb.mxu2 %v2443_v5 }
 0xfc9   : > { %v3763_v11 = vadd.f32 %v2280_v7, %v2272_v8 }
 0xfca   : > { %2464 = vmatpush.msrb.mxu1 %v2442_v38  ;;  %2527 = vmatpush.msrb.mxu2 %v2442_v38 }
 0xfcb   : > { %v2284_v63 = vmax.f32 %v3763_v11, 0.0  ;;  %v2410_v11 = vld [vmem:[%s3944_s7 + $0x20] sm:$0xff]  ;;  %2465 = vmatmul.f32.vlgmr.msrb.gmra.mxu1 %v3143_v24 }
 0xfcc   : > { %2433 = vmatpush.msrb.mxu0 %v2410_v11 }
 0xfcd   : > { %v2291_v40 = vmul.f32 %v2945_v61, %v2284_v63 }
 0xfcf   : > { %v2293_v12 = vsel %vm505_vm0, %v2291_v40, 0.0  ;;  %v1768_v40 = vadd.f32 %v1767_v50, %v3673_v6 }
 0xfd0   : > { %2294 = vadd.xlane.f32.xlu1 %v2293_v12  ;;  %v2409_v12 = vld [vmem:[%s3944_s7 + $0x18] sm:$0xff] }
 0xfd1   : > { %v2275_v10 = vpop.f32.mrf.mxu3  ;;  %2434 = vmatpush.msrb.mxu0 %v2409_v12 }
 0xfd2   : > { %v2246_v16 = vpop.f32.mrf.mxu2 }
 0xfd3   : > { %v2217_v13 = vpop.f32.mrf.mxu1 }
 0xfd4   : > { %v2188_v14 = vpop.f32.mrf.mxu0 }
 0xfd5   : > { %v2279_v15 = vadd.f32 %v2217_v13, %v2188_v14  ;;  %v2408_v14 = vld [vmem:[%s3944_s7 + $0x10] sm:$0xff] }
 0xfd6   : > { %2435 = vmatpush.msrb.mxu0 %v2408_v14 }
 0xfd7   : > { %v2281_v18 = vadd.f32 %v2279_v15, %v2246_v16  ;;  %v1769_v16 = vrot.slane %v1768_v40, 2 }
 0xfd8   : > { %2436 = vmatpush.msrb.mxu0 %v2407_v37 }
 0xfd9   : > { %v2283_v42 = vadd.f32 %v2281_v18, %v2275_v10 }
 0xfda   : > { %2437 = vmatpush.msrb.mxu0 %v2406_v48 }
 0xfdb   : > { %v2285_v23 = vmax.f32 %v2283_v42, 0.0  ;;  %v1770_v42 = vadd.f32 %v1769_v16, %v1768_v40 }
 0xfdc   : > { %2594 = vmatpush.msra.mxu0 %v3807_v56 }
 0xfdd   : > { %v2292_v32 = vmul.f32 %v2945_v61, %v2285_v23  ;;  %v1126_v61 = vrot.slane %v3490_v57, 4 }
 0xfde   : > { %2595 = vmatpush.msra.mxu0 %v2444_v2 }
 0xfdf   : > { %v2296_v27 = vsel %vm505_vm0, %v2292_v32, 0.0  ;;  %v1127_v18 = vadd.f32 %v1126_v61, %v3490_v57 }
 0xfe0   : > { %2297 = vadd.xlane.f32.xlu2 %v2296_v27  ;;  %2596 = vmatpush.msra.mxu0 %v2443_v5 }
 0xfe2   : > { %2597 = vmatpush.msra.mxu0 %v2442_v38 }
0x1043   : > { %v2295_v28 = vpop.xlane.xlu1 %2294 }
0x1044   : > { %v2299_v29 = vsel %vm1774_vm9, %v2295_v28, -1e+30 }
0x1045   : > { %2301 = vxpose.xlu0.b32.start [1/2] (short) (narrow) %v2299_v29, 8 }
0x1053   : > { %v2298_v31 = vpop.xlane.xlu2 %2297 }
0x1054   : > { %v2300_v34 = vsel %vm1775_vm14, %v2298_v31, -1e+30  ;;  %3051 = vtanh.f32 %v2298_v31 }
0x1055   : > { %2302 = vxpose.xlu0.b32.end [2/2] (short) (narrow) %v2300_v34, 8  ;;  %3053 = vtanh.f32 %v2295_v28  ;;  %v1771_v28 = vrot.slane %v1770_v42, 1 }
0x1057   : > { %v1772_v31 = vadd.f32 %v1771_v28, %v1770_v42 }
0x105a   : > { %v3052_v9 = vpop.eup %3051 }
0x105b   : > { %v3054_v43 = vpop.eup %3053  ;;  %v2361_v47 = vmul.f32 %v3052_v9, %v2285_v23  ;;  %v1128_v23 = vrot.slane %v1127_v18, 2 }
0x105c   : > { %v2360_v46 = vmul.f32 %v3054_v43, %v2284_v63 }
0x10f1   : > { %v2317_v19 = vpop.trf.xlu0 }
0x10f2   : > { %v2333_v26 = vperm.slane %v2317_v19, 0 }
0x10f4   : > { %vm2335_vm11 = vcmp.gt.f32.partialorder %v2333_v26, %v2300_v34  ;;  %vm2337_vm10 = vcmp.eq.f32.partialorder %v2333_v26, %v2300_v34  ;;  %vm2336_vm15 = vcmp.eq.f32.partialorder %v2333_v26, %v2299_v29  ;;  %vm2334_vm4 = vcmp.gt.f32.partialorder %v2333_v26, %v2299_v29 }
0x10f5   : > { %vm2339_vm2 = vmand %vm2337_vm10, %vm1055_vm12  ;;  %v1129_v29 = vadd.f32 %v1128_v23, %v1127_v18  ;;  %v1773_v26 = vmul.f32 0.25, %v1772_v31 }
0x10f6   : > { %vm2341_vm5 = vmor %vm2335_vm11, %vm2339_vm2 }
0x10f7   : > { %v2875_v58 = vsel %vm2341_vm5, 1.0, %v3143_v24  ;;  %vm2338_vm9 = vmand %vm2336_vm15, %vm1054_vm1  ;;  %v1130_v34 = vrot.slane %v1129_v29, 1 }
0x10f8   : > { %v2349_v0 = vsel %vm769_vm3, %v2875_v58, 0.0  ;;  %vm2340_vm14 = vmor %vm2334_vm4, %vm2338_vm9 }
0x10f9   : > { %2350 = vadd.xlane.f32.xlu2 %v2349_v0  ;;  %v2874_v35 = vsel %vm2340_vm14, 1.0, %v3143_v24  ;;  %v1131_v58 = vadd.f32 %v1130_v34, %v1129_v29 }
0x10fa   : > { %v2346_v20 = vsel %vm769_vm3, %v2874_v35, 0.0 }
0x10fb   : > { %2347 = vadd.xlane.f32.xlu1 %v2346_v20  ;;  %v1132_v57 = vmul.f32 0.125, %v1131_v58 }
0x1114   : > { %1792 = vrot.lane.b32.xlu1 %v1790_v44, %s3144_s20 }
0x111c   : > { %1151 = vrot.lane.b32.xlu1 %v1149_v30, %s3144_s20 }
0x116c   : > { %v2351_v45 = vpop.xlane.xlu2 %2350 }
0x116d   : > { %vm2353_vm3 = vcmp.lt.f32.partialorder %v2351_v45, 2.0 }
0x116e   : > { %v2877_v59 = vsel %vm2353_vm3, 1.0, %v3143_v24  ;;  %v2348_v49 = vpop.xlane.xlu1 %2347 }
0x116f   : > { %v2363_v41 = vmul.f32 %v2877_v59, %v2361_v47  ;;  %vm2375_vm12 = vcmp.gt.f32.partialorder %v2877_v59, 0.0  ;;  %vm2352_vm1 = vcmp.lt.f32.partialorder %v2348_v49, 2.0  ;;  %v2466_v49 = vpop.f32.mrf.mxu1 }
0x1170   : > { %v2876_v52 = vsel %vm2352_vm1, 1.0, %v3143_v24  ;;  %v2946_v24 = vld [vmem:[%s3946_s9] ss:$0 sm:$0xff] }
0x1171   : > { %v2365_v60 = vsel %vm505_vm0, %v2363_v41, 0.0  ;;  %v2381_v55 = vsel %vm2375_vm12, %v2363_v41, -1e+30  ;;  %v2362_v51 = vmul.f32 %v2876_v52, %v2360_v46  ;;  %vm2374_vm6 = vcmp.gt.f32.partialorder %v2876_v52, 0.0 }
0x1172   : > { %v2383_v62 = vsel %vm505_vm0, %v2381_v55, -inf }
0x1173   : > { %v2364_v3 = vsel %vm505_vm0, %v2362_v51, 0.0  ;;  %v2380_v4 = vsel %vm2374_vm6, %v2362_v51, -1e+30 }
0x1174   : > { %v2366_v7 = vadd.f32 %v2365_v60, %v2364_v3  ;;  %v2382_v8 = vsel %vm505_vm0, %v2380_v4, -inf }
0x1175   : > { %v2384_v63 = vmax.f32 %v2382_v8, %v2383_v62 }
0x1176   : > { %v2367_v33 = vrot.slane %v2366_v7, 4 }
0x1177   : > { %v2385_v13 = vrot.slane %v2384_v63, 4 }
0x1178   : > { %v2368_v22 = vadd.f32 %v2367_v33, %v2366_v7 }
0x1179   : > { %v2386_v15 = vmax.f32 %v2384_v63, %v2385_v13 }
0x117a   : > { %v2369_v39 = vrot.slane %v2368_v22, 2 }
0x117b   : > { %v2387_v10 = vrot.slane %v2386_v15, 2 }
0x117c   : > { %v2370_v44 = vadd.f32 %v2369_v39, %v2368_v22 }
0x117d   : > { %v2388_v6 = vmax.f32 %v2386_v15, %v2387_v10 }
0x117e   : > { %v2371_v17 = vrot.slane %v2370_v44, 1 }
0x117f   : > { %v2389_v32 = vrot.slane %v2388_v6, 1 }
0x1180   : > { %v2372_v25 = vadd.f32 %v2371_v17, %v2370_v44 }
0x1181   : > { %v2390_v27 = vmax.f32 %v2388_v6, %v2389_v32 }
0x1182   : > { %v2373_v30 = vmul.f32 0.5, %v2372_v25 }
0x1183   : > { %2392 = vrot.lane.b32.xlu2 %v2390_v27, %s3144_s20 }
0x1186   : > { %v1793_v19 = vpop.permute.xlu1 %1792 }
0x1187   : > { %v1795_v0 = vsel %vm505_vm0, %v1773_v26, %v1793_v19 }
0x1188   : > { %v2397_v35 = vrot.slane %v1795_v0, 7 }
0x118e   : > { %v1152_v20 = vpop.permute.xlu1 %1151 }
0x118f   : > { %v1154_v36 = vsel %vm505_vm0, %v1132_v57, %v1152_v20 }
0x1190   : > { %v2403_v21 = vsel %vm2402_vm7, %v1154_v36, %v2397_v35  ;;  %vm2706_vm7 = vcmask 24576  }
0x11dd   : > { %v2393_v9 = vpop.permute.xlu2 %2392 }
0x11de   : > { %v2395_v43 = vsel %vm505_vm0, %v2373_v30, %v2393_v9 }
0x11df   : > { %v2400_v45 = vrot.slane %v2395_v43, 6 }
0x11e1   : > { %v2405_v47 = vsel %vm2404_vm8, %v2403_v21, %v2400_v45 }
0x11e2   : > { %2878 = vmatmul.msk.f32.vlgmr.msrb.gmra.mxu0 %vm2418_vm13, %v2405_v47 }
0x125f   : > { %v2439_v59 = vpop.f32.mrf.mxu0 }
0x1260   : > { %v3854_v41 = vadd.f32 %v2946_v24, %v2439_v59 }
0x1262   : > { %v2469_v46 = vadd.f32 %v2466_v49, %v3854_v41 }
0x1264   : > { %3055 = vtanh.f32 %v2469_v46  ;;  %v2879_v52 = vmul.f32 -1.442695, %v2469_v46 }
0x1266   : > { %3057 = vpow2.f32 %v2879_v52 }
0x126a   : > { %v3056_v50 = vpop.eup %3055 }
0x126b   : > { %2492 = vrot.lane.b32.xlu2 %v3056_v50, %s3145_s27 }
0x126c   : > { %v3058_v53 = vpop.eup %3057 }
0x126d   : > { %v2473_v54 = vadd.f32 1.0, %v3058_v53 }
0x126f   : > { %3059 = vrcp.f32 %v2473_v54  ;;  %v2485_v1 = vand.u32 2147483648, %v2473_v54  ;;  %vm2479_vm10 = vweird.f32 %v2473_v54  ;;  %v2483_v2 = vand.u32 2147483647, %v2473_v54 }
0x1271   : > { %v2486_v4 = vor.u32 1.1754944e-38, %v2485_v1  ;;  %vm2484_vm2 = vcmp.eq.f32.partialorder %v2483_v2, 8.507059e+37 }
0x1275   : > { %v3060_v56 = vpop.eup %3059 }
0x1276   : > { %v2475_v60 = vmul.f32 %v3060_v56, %v2473_v54  ;;  %vm2480_vm11 = vweird.f32 %v3060_v56 }
0x1277   : > { %vm2481_vm15 = vmor %vm2479_vm10, %vm2480_vm11 }
0x1278   : > { %v2476_v55 = vsub.f32 1.0, %v2475_v60 }
0x127a   : > { %v2477_v51 = vmul.f32 %v3060_v56, %v2476_v55 }
0x127c   : > { %v2478_v62 = vadd.f32 %v3060_v56, %v2477_v51 }
0x127e   : > { %v2482_v3 = vsel %vm2481_vm15, %v3060_v56, %v2478_v62 }
0x127f   : > { %v2487_v7 = vsel %vm2484_vm2, %v2486_v4, %v2482_v3  ;;  %v2649_v3 = vld [vmem:[%s3947_s10 + $0x18] sm:$0xff]  ;;  %v2648_v4 = vld [vmem:[%s3947_s10 + $0x10] sm:$0xff] }
0x1280   : > { %v2490_v11 = vmul.f32 0.0, %v2487_v7  ;;  %2669 = vmatpush.msra.mxu1 %v2649_v3 }
0x1282   : > { %2670 = vmatpush.msra.mxu1 %v2648_v4 }
0x12c5   : > { %v2493_v5 = vpop.permute.xlu2 %2492 }
0x12c6   : > { %v2495_v8 = vmul.f32 %v2493_v5, %v2487_v7  ;;  %v2647_v5 = vld [vmem:[%s3947_s10 + $0x8] sm:$0xff] }
0x12c7   : > { %2671 = vmatpush.msra.mxu1 %v2647_v5 }
0x12c8   : > { %2497 = vrot.lane.b32.xlu1 %v2495_v8, %s3144_s20 }
0x133a   : > { %v2498_v61 = vpop.permute.xlu1 %2497 }
0x133b   : > { %v2500_v63 = vadd.f32 %v2498_v61, %v2490_v11 }
0x133d   : > { %3061 = vtanh.f32 %v2500_v63  ;;  %v2557_v20 = vrot.slane %v2500_v63, 7  ;;  %v2681_v63 = vld [vmem:[%s3949_s12 + $0x18] sm:$0xff] }
0x133e   : > { %2698 = vmatpush.msra.mxu2 %v2681_v63 }
0x1343   : > { %v3062_v40 = vpop.eup %3061 }
0x1344   : > { %2503 = vrot.lane.b32.xlu2 %v3062_v40, %s3145_s27  ;;  %v2680_v40 = vld [vmem:[%s3949_s12 + $0x10] sm:$0xff] }
0x1345   : > { %2699 = vmatpush.msra.mxu2 %v2680_v40 }
0x139e   : > { %v2504_v12 = vpop.permute.xlu2 %2503 }
0x139f   : > { %v2506_v13 = vmul.f32 %v2504_v12, %v2487_v7  ;;  %v2646_v7 = vld [vmem:[%s3947_s10] sm:$0xff] }
0x13a0   : > { %2672 = vmatpush.msra.mxu1 %v2646_v7 }
0x13a1   : > { %2508 = vrot.lane.b32.xlu0 %v2506_v13, %s3144_s20  ;;  %v2679_v13 = vld [vmem:[%s3949_s12 + $0x8] sm:$0xff] }
0x13a2   : > { %2700 = vmatpush.msra.mxu2 %v2679_v13 }
0x1413   : > { %v2509_v14 = vpop.permute.xlu0 %2508 }
0x1414   : > { %2880 = vmatmul.msk.f32.vlgmr.msrb.gmra.mxu2 %vm505_vm0, %v2509_v14  ;;  %v2678_v14 = vld [vmem:[%s3949_s12] sm:$0xff] }
0x1415   : > { %2701 = vmatpush.msra.mxu2 %v2678_v14 }
0x1497   : > { %v2529_v15 = vpop.f32.mrf.mxu2 }
0x1498   : > { %v2533_v16 = vrot.slane %v2529_v15, 7  ;;  %v2650_v15 = vld [vmem:[%s3948_s11] sm:$0x1] }
0x149a   : > { %v2535_v18 = vadd.f32 %v2533_v16, %v3854_v41 }
0x149c   : > { %3063 = vtanh.f32 %v2535_v18  ;;  %v2881_v6 = vmul.f32 -1.442695, %v2535_v18 }
0x149e   : > { %3065 = vpow2.f32 %v2881_v6  ;;  %v2682_v6 = vld [vmem:[%s3950_s13] sm:$0x1] }
0x14a2   : > { %v3064_v10 = vpop.eup %3063 }
0x14a3   : > { %2561 = vrot.lane.b32.xlu1 %v3064_v10, %s3145_s27 }
0x14a4   : > { %v3066_v42 = vpop.eup %3065 }
0x14a5   : > { %v2539_v23 = vadd.f32 1.0, %v3066_v42 }
0x14a7   : > { %3067 = vrcp.f32 %v2539_v23  ;;  %v2551_v34 = vand.u32 2147483648, %v2539_v23  ;;  %vm2545_vm5 = vweird.f32 %v2539_v23  ;;  %v2549_v19 = vand.u32 2147483647, %v2539_v23 }
0x14a9   : > { %v2552_v58 = vor.u32 1.1754944e-38, %v2551_v34  ;;  %vm2550_vm14 = vcmp.eq.f32.partialorder %v2549_v19, 8.507059e+37 }
0x14ad   : > { %v3068_v32 = vpop.eup %3067 }
0x14ae   : > { %v2541_v27 = vmul.f32 %v3068_v32, %v2539_v23  ;;  %vm2546_vm4 = vweird.f32 %v3068_v32 }
0x14af   : > { %vm2547_vm9 = vmor %vm2545_vm5, %vm2546_vm4 }
0x14b0   : > { %v2542_v28 = vsub.f32 1.0, %v2541_v27 }
0x14b2   : > { %v2543_v29 = vmul.f32 %v3068_v32, %v2542_v28 }
0x14b4   : > { %v2544_v31 = vadd.f32 %v3068_v32, %v2543_v29 }
0x14b6   : > { %v2548_v26 = vsel %vm2547_vm9, %v3068_v32, %v2544_v31 }
0x14b7   : > { %v2553_v57 = vsel %vm2550_vm14, %v2552_v58, %v2548_v26 }
0x14b8   : > { %v2559_v36 = vmul.f32 %v2557_v20, %v2553_v57 }
0x1515   : > { %v2562_v0 = vpop.permute.xlu1 %2561 }
0x1516   : > { %v2564_v35 = vmul.f32 %v2562_v0, %v2553_v57 }
0x1518   : > { %2566 = vrot.lane.b32.xlu2 %v2564_v35, %s3144_s20 }
0x1572   : > { %v2567_v21 = vpop.permute.xlu2 %2566 }
0x1573   : > { %v2569_v37 = vadd.f32 %v2567_v21, %v2559_v36 }
0x1575   : > { %3069 = vtanh.f32 %v2569_v37  ;;  %v2627_v55 = vrot.slane %v2569_v37, 7 }
0x157b   : > { %v3070_v48 = vpop.eup %3069 }
0x157c   : > { %2572 = vrot.lane.b32.xlu1 %v3070_v48, %s3145_s27 }
0x15ee   : > { %v2573_v38 = vpop.permute.xlu1 %2572 }
0x15ef   : > { %v2575_v33 = vmul.f32 %v2573_v38, %v2553_v57 }
0x15f1   : > { %v2577_v22 = vrot.slane %v2575_v33, 1 }
0x15f3   : > { %2578 = vrot.lane.b32.xlu2 %v2577_v22, %s3144_s20 }
0x164d   : > { %v2579_v39 = vpop.permute.xlu2 %2578 }
0x164e   : > { %2882 = vmatmul.msk.f32.vlgmr.msra.gmra.mxu0 %vm505_vm0, %v2579_v39 }
0x16cb   : > { %v2599_v44 = vpop.f32.mrf.mxu0 }
0x16cc   : > { %v2603_v17 = vrot.slane %v2599_v44, 6 }
0x16ce   : > { %v2605_v25 = vadd.f32 %v2603_v17, %v3854_v41 }
0x16d0   : > { %3071 = vtanh.f32 %v2605_v25  ;;  %v2883_v9 = vmul.f32 -1.442695, %v2605_v25 }
0x16d2   : > { %3073 = vpow2.f32 %v2883_v9 }
0x16d6   : > { %v3072_v30 = vpop.eup %3071 }
0x16d7   : > { %2631 = vrot.lane.b32.xlu1 %v3072_v30, %s3145_s27 }
0x16d8   : > { %v3074_v43 = vpop.eup %3073 }
0x16d9   : > { %v2609_v45 = vadd.f32 1.0, %v3074_v43 }
0x16db   : > { %3075 = vrcp.f32 %v2609_v45  ;;  %v2621_v50 = vand.u32 2147483648, %v2609_v45  ;;  %vm2615_vm12 = vweird.f32 %v2609_v45  ;;  %v2619_v52 = vand.u32 2147483647, %v2609_v45 }
0x16dd   : > { %v2622_v53 = vor.u32 1.1754944e-38, %v2621_v50  ;;  %vm2620_vm6 = vcmp.eq.f32.partialorder %v2619_v52, 8.507059e+37 }
0x16e1   : > { %v3076_v47 = vpop.eup %3075 }
0x16e2   : > { %v2611_v24 = vmul.f32 %v3076_v47, %v2609_v45  ;;  %vm2616_vm3 = vweird.f32 %v3076_v47 }
0x16e3   : > { %vm2617_vm1 = vmor %vm2615_vm12, %vm2616_vm3 }
0x16e4   : > { %v2612_v59 = vsub.f32 1.0, %v2611_v24 }
0x16e6   : > { %v2613_v49 = vmul.f32 %v3076_v47, %v2612_v59 }
0x16e8   : > { %v2614_v46 = vadd.f32 %v3076_v47, %v2613_v49 }
0x16ea   : > { %v2618_v41 = vsel %vm2617_vm1, %v3076_v47, %v2614_v46 }
0x16eb   : > { %v2623_v56 = vsel %vm2620_vm6, %v2622_v53, %v2618_v41 }
0x16ec   : > { %v2629_v51 = vmul.f32 %v2627_v55, %v2623_v56 }
0x1749   : > { %v2632_v54 = vpop.permute.xlu1 %2631 }
0x174a   : > { %v2634_v60 = vmul.f32 %v2632_v54, %v2623_v56 }
0x174c   : > { %2636 = vrot.lane.b32.xlu2 %v2634_v60, %s3144_s20 }
0x17a6   : > { %v2637_v62 = vpop.permute.xlu2 %2636 }
0x17a7   : > { %v2639_v1 = vadd.f32 %v2637_v62, %v2629_v51 }
0x17a9   : > { %3077 = vtanh.f32 %v2639_v1 }
0x17af   : > { %v3078_v2 = vpop.eup %3077 }
0x17b0   : > { %2642 = vrot.lane.b32.xlu1 %v3078_v2, %s3145_s27 }
0x1822   : > { %v2643_v8 = vpop.permute.xlu1 %2642 }
0x1823   : > { %v2645_v11 = vmul.f32 %v2643_v8, %v2623_v56 }
0x1825   : > { %v2652_v61 = vrot.slane %v2645_v11, 2 }
0x1827   : > { %2653 = vrot.lane.b32.xlu2 %v2652_v61, %s3144_s20  ;;  %s2721_s20 = sshll.u32 %s2717_s26, 4  ;;  %s2722_s20 = int_to_ptr.hbm [resolvable:$true] %s2721_s20 }
0x1828   : > { %s3093_s18 = sshra.s32 %s2722_s20, 4  ;;  %s3094_s18 = int_to_ptr.hbm [resolvable:$true] %s3093_s18 }
0x1829   : > { %s3095_s22 = scalar_lea.hbm %s3094_s18, 1  ;;  %p3100_p0 = scmp.lt.s32.totalorder %s3094_s18, %s3951_s14 }
0x182a   : > { %p3096_p11 = scmp.ne.s32.totalorder %s3094_s18, %s3095_s22  ;;  %p3101_p1 = scmp.lt.s32.totalorder %s3099_s21, %s3095_s22 }
0x182c   : > { %p3097_p12 = pnand %p3096_p11, %p3259_p5  ;;  %p3102_p2 = por %p3101_p1, %p3100_p0 }
0x182e   : > { %p3098_p13 = pneg %p3097_p12 }
0x1830   : > { %p3103_p3 = pnand %p3102_p2, %p3098_p13 }
0x1881   : > { %v2654_v12 = vpop.permute.xlu2 %2653 }
0x1882   : > { %2884 = vmatmul.msk.f32.vlgmr.msra.gmra.mxu1 %vm505_vm0, %v2654_v12 }
0x18ff   : > { %v2674_v16 = vpop.f32.mrf.mxu1 }
0x1900   : > { %v2675_v18 = vadd.f32 %v2674_v16, %v2650_v15 }
0x1902   : > { %v2677_v10 = vmax.f32 %v2675_v18, 0.0 }
0x1904   : > { %2885 = vmatmul.msk.f32.vlgmr.msra.gmra.mxu2 %vm505_vm0, %v2677_v10 }
0x1987   : > { %v2703_v42 = vpop.f32.mrf.mxu2 }
0x1988   : > { %v2704_v23 = vadd.f32 %v2703_v42, %v2682_v6 }
0x198a   : > { %2707 = vst.msk [vmem:[%s474_s25] sm:$0x1] %vm2706_vm7, %v2704_v23 }
0x198b   : > { %3106 = shalt.err (!%p3103_p3)
}
0x198c   : > { %2890 = dma.vmem_to_hbm [thread:$0]  (%p3259_p5), %s2720_s28, 16, %s2722_s20, %s2709_s24  }
0x198d PF: > { %s3968_s15 = sld [smem:[#allocation5_spill]]  ;;  %p2896_p4 = scmp.ge.s32.totalorder %s3141_s16, 2 }
0x198f   : > { %p2893_p7 = pnand %p2896_p4, %p3263_p6 }
0x1991   : > { %p2894_p8 = pneg %p2893_p7 }
0x1993   : > { %s2733_s25 = sand.u32 1, %s3968_s15  }
0x1994   : > { %s2734_s17 = scalar_lea.sflag [#allocation3], %s2733_s25 }
0x1995   : > { %3124 = dma.done.wait (%p2894_p8), %s2734_s17, 16  }
0x1996   : > { %3126 = vsyncadd (%p2894_p8), %s2734_s17, 4294967280  ;;  %s3970_s16 = sld [smem:[#allocation7_spill]]  ;;  %s3973_s29 = smov %s3133_s30 }
0x1997   : > { %s3971_s18 = sld [smem:[#allocation6_spill]] }
0x1998   : > { %s3972_s15 = sld [smem:[#allocation8_spill]] }
0x199c   : > { %p24_p9 = scmp.ge.s32.totalorder %s3970_s16, 4  }
0x199d   : > { %s3974_s30 = smov %s3971_s18 }
0x199e   :  { %26 = sbr.rel (!%p24_p9) target bundleno = 3 (0x3), region = 122 }
0x19a3   :  { %2739 = vsyncpa [#allocation3], 1 }
0x19a4   :  { %2741 = vsyncpa [#allocation3 + $0x1], 1 }

</bundles_post_ra>
